<compile_context>
chip_gen: v7x
topology: tpu7x:2x2x1
jax: 0.10.0
libtpu: 0.0.40
codegen_flags: <defaults>
</compile_context>

<pallas_src>
import math

import jax
import jax.numpy as jnp
from jax import lax
from jax.experimental import pallas as pl
from jax.experimental.pallas import tpu as pltpu


_CHUNK_ROWS = 8  # sublane granule processed register-resident per inner step


def _make_kernel(N, P, chunk_rows=_CHUNK_ROWS):
    """Build a kernel closure with the static module config (N, P) baked in."""
    J = len(N)
    two_pi = 2.0 * math.pi

    def kernel(a_ref, b_ref, t_ref, o_ref):
        # a_ref / b_ref : SMEM, shape (maxN * J,) float32, row-major (k, j)
        # t_ref / o_ref : VMEM tile, shape (tile_rows, lanes) float32
        tile_rows = t_ref.shape[0]
        n_chunks = tile_rows // chunk_rows

        @pl.loop(0, n_chunks)
        def _(ci):
            r0 = pl.multiple_of(ci * chunk_rows, chunk_rows)
            t = t_ref[pl.ds(r0, chunk_rows), :]
            acc = jnp.zeros_like(t)

            for j in range(J):  # static, small
                w = two_pi / float(P[j])
                # Base angle: only transcendentals for this period (EUP).
                c1 = jnp.cos(w * t)
                s1 = jnp.sin(w * t)
                # Harmonic k = 0 (frequency 1 * w).
                acc = acc + a_ref[j] * c1 + b_ref[j] * s1

                # Angle-addition recurrence for harmonics 1 .. N[j]-1 (VALU only).
                def body(k, carry, c1=c1, s1=s1, j=j):
                    c, s, acc_ = carry
                    cn = c * c1 - s * s1          # cos((k+1) * w * t)
                    sn = s * c1 + c * s1          # sin((k+1) * w * t)
                    acc_ = acc_ + a_ref[k * J + j] * cn + b_ref[k * J + j] * sn
                    return (cn, sn, acc_)

                if N[j] > 1:
                    _, _, acc = lax.fori_loop(
                        1, N[j], body, (c1, s1, acc), unroll=True
                    )

            o_ref[pl.ds(r0, chunk_rows), :] = acc

    return kernel


def multi_fourier(t, a, b, N, P, *, tile_rows=64, lanes=512):
    """Pallas implementation of MultiFourier.forward(t).

    t: any-shape float array (the torch forward uses (B, L)); a, b: (maxN, J).
    """
    orig_shape = t.shape
    t32 = t.astype(jnp.float32).reshape(-1)
    total = t32.shape[0]

    # Lane-dense slab: flatten, pad to a whole number of (tile_rows, lanes)
    # tiles so every store is a full 128-lane-multiple vst and every tile is
    # (8, 128)-aligned.
    tile_elems = tile_rows * lanes
    n_tiles = max(1, pl.cdiv(total, tile_elems))
    padded = n_tiles * tile_elems
    t_pad = jnp.pad(t32, (0, padded - total))
    t2 = t_pad.reshape(padded // lanes, lanes)  # (n_tiles * tile_rows, lanes)

    # Coefficients, flattened row-major (k, j) -> index k*J + j; harmonics past
    # N[j] are never read by the kernel (loop bound is N[j]).
    a_flat = a.astype(jnp.float32).reshape(-1)
    b_flat = b.astype(jnp.float32).reshape(-1)

    kernel = _make_kernel(N, P)

    out2 = pl.pallas_call(
        kernel,
        out_shape=jax.ShapeDtypeStruct(t2.shape, jnp.float32),
        grid_spec=pltpu.PrefetchScalarGridSpec(
            num_scalar_prefetch=0,
            grid=(n_tiles,),
            in_specs=[
                pl.BlockSpec(memory_space=pltpu.MemorySpace.SMEM),   # a (flat)
                pl.BlockSpec(memory_space=pltpu.MemorySpace.SMEM),   # b (flat)
                pl.BlockSpec((tile_rows, lanes), lambda i: (i, 0)),  # t tile
            ],
            out_specs=pl.BlockSpec((tile_rows, lanes), lambda i: (i, 0)),
        ),
        compiler_params=pltpu.CompilerParams(
            dimension_semantics=("parallel",),        # shard tiles across TCs (v7x)
            vmem_limit_bytes=32 * 1024 * 1024,        # safe on v5e/v6e/v7x
        ),
    )(a_flat, b_flat, t2)

    return out2.reshape(-1)[:total].reshape(orig_shape)


def multi_fourier_ref(t, a, b, N, P):
    """Plain-JAX mirror of the torch forward (elementwise, no MXU) for checks."""
    out = jnp.zeros_like(t, dtype=jnp.float32)
    tf = t.astype(jnp.float32)
    for j in range(len(N)):
        n = jnp.arange(N[j], dtype=jnp.float32)
        ang = 2.0 * math.pi * (n + 1.0) * tf[..., None] / float(P[j])
        out = out + jnp.sum(jnp.cos(ang) * a[: N[j], j], axis=-1)
        out = out + jnp.sum(jnp.sin(ang) * b[: N[j], j], axis=-1)
    return out


if __name__ == "__main__":
    # Module config: N = list of harmonic counts, P = list of periods.
    N = [4, 8]
    P = [3.0, 7.0]

    key = jax.random.PRNGKey(0)
    ka, kb, kt = jax.random.split(key, 3)

    # Deterministic parameter init (torch.randn(max(N), len(N)) equivalents).
    a = jax.random.normal(ka, (max(N), len(N)), dtype=jnp.float32)
    b = jax.random.normal(kb, (max(N), len(N)), dtype=jnp.float32)

    # Input t: (batch=2, seq=16) — the forward treats t as 2-D (B, L).
    t = jax.random.normal(kt, (2, 16), dtype=jnp.float32)

    out = multi_fourier(t, a, b, N, P)
    out = jax.block_until_ready(out)

    ref = multi_fourier_ref(t, a, b, N, P)
    assert out.shape == t.shape and out.dtype == jnp.float32
    max_err = float(jnp.max(jnp.abs(out - ref)))
    assert jnp.allclose(out, ref, atol=1e-4, rtol=1e-4), (
        f"mismatch vs reference (max abs err {max_err:.3e})"
    )

    print("KERNEL_OK")
</pallas_src>

<mosaic_0001>
module attributes {stable_mosaic.version = 11 : i64} {
  func.func @kernel(%arg0: i32, %arg1: memref<16xf32, #tpu.memory_space<smem>>, %arg2: memref<16xf32, #tpu.memory_space<smem>>, %arg3: memref<64x512xf32, #tpu.memory_space<vmem>>, %arg4: memref<64x512xf32, #tpu.memory_space<vmem>>) attributes {dimension_semantics = [#tpu.dimension_semantics<parallel>], iteration_bounds = array<i64: 1>, scalar_prefetch = 0 : i64, scratch_operands = 0 : i64, tpu.core_type = #tpu.core_type<tc>, window_params = [{transform_indices = @transform_0, window_bounds = array<i64: 16>}, {transform_indices = @transform_1, window_bounds = array<i64: 16>}, {transform_indices = @transform_2, window_bounds = array<i64: 64, 512>}, {transform_indices = @transform_3, window_bounds = array<i64: 64, 512>}]} {
    %c0_i32 = arith.constant 0 : i32
    %c8_i32 = arith.constant 8 : i32
    %0 = arith.addi %c0_i32, %c8_i32 : i32
    %c1_i32 = arith.constant 1 : i32
    scf.for %arg5 = %c0_i32 to %0 step %c1_i32  : i32 {
      %c1_i32_1 = arith.constant 1 : i32
      %1 = arith.muli %arg5, %c1_i32_1 : i32
      %c0_i32_2 = arith.constant 0 : i32
      %2 = arith.addi %c0_i32_2, %1 : i32
      %c8_i32_3 = arith.constant 8 : i32
      %3 = arith.muli %2, %c8_i32_3 : i32
      %4 = tpu.assume_multiple %3, 8 : i32
      %5 = arith.index_cast %4 : i32 to index
      %c0 = arith.constant 0 : index
      %6 = vector.load %arg3[%5, %c0] : memref<64x512xf32, #tpu.memory_space<vmem>>, vector<8x512xf32>
      %cst = arith.constant 0.000000e+00 : f32
      %7 = vector.broadcast %cst : f32 to vector<8x512xf32>
      %cst_4 = arith.constant 2.09439516 : f32
      %8 = vector.broadcast %cst_4 : f32 to vector<8x512xf32>
      %9 = arith.mulf %8, %6 : vector<8x512xf32>
      %10 = math.cos %9 : vector<8x512xf32>
      %cst_5 = arith.constant 2.09439516 : f32
      %11 = vector.broadcast %cst_5 : f32 to vector<8x512xf32>
      %12 = arith.mulf %11, %6 : vector<8x512xf32>
      %13 = math.sin %12 : vector<8x512xf32>
      %c0_6 = arith.constant 0 : index
      %14 = memref.load %arg1[%c0_6] : memref<16xf32, #tpu.memory_space<smem>>
      %15 = vector.broadcast %14 : f32 to vector<8x512xf32>
      %16 = arith.mulf %15, %10 : vector<8x512xf32>
      %17 = arith.addf %7, %16 : vector<8x512xf32>
      %c0_7 = arith.constant 0 : index
      %18 = memref.load %arg2[%c0_7] : memref<16xf32, #tpu.memory_space<smem>>
      %19 = vector.broadcast %18 : f32 to vector<8x512xf32>
      %20 = arith.mulf %19, %13 : vector<8x512xf32>
      %21 = arith.addf %17, %20 : vector<8x512xf32>
      %c1_i32_8 = arith.constant 1 : i32
      %22 = arith.mulf %10, %10 : vector<8x512xf32>
      %23 = arith.mulf %13, %13 : vector<8x512xf32>
      %24 = arith.subf %22, %23 : vector<8x512xf32>
      %25 = arith.mulf %13, %10 : vector<8x512xf32>
      %26 = arith.mulf %10, %13 : vector<8x512xf32>
      %27 = arith.addf %25, %26 : vector<8x512xf32>
      %c2_i32 = arith.constant 2 : i32
      %28 = arith.muli %c1_i32_8, %c2_i32 : i32
      %c0_i32_9 = arith.constant 0 : i32
      %29 = arith.addi %28, %c0_i32_9 : i32
      %30 = arith.index_cast %29 : i32 to index
      %31 = memref.load %arg1[%30] : memref<16xf32, #tpu.memory_space<smem>>
      %32 = vector.broadcast %31 : f32 to vector<8x512xf32>
      %33 = arith.mulf %32, %24 : vector<8x512xf32>
      %34 = arith.addf %21, %33 : vector<8x512xf32>
      %c2_i32_10 = arith.constant 2 : i32
      %35 = arith.muli %c1_i32_8, %c2_i32_10 : i32
      %c0_i32_11 = arith.constant 0 : i32
      %36 = arith.addi %35, %c0_i32_11 : i32
      %37 = arith.index_cast %36 : i32 to index
      %38 = memref.load %arg2[%37] : memref<16xf32, #tpu.memory_space<smem>>
      %39 = vector.broadcast %38 : f32 to vector<8x512xf32>
      %40 = arith.mulf %39, %27 : vector<8x512xf32>
      %41 = arith.addf %34, %40 : vector<8x512xf32>
      %c2_i32_12 = arith.constant 2 : i32
      %42 = arith.mulf %24, %10 : vector<8x512xf32>
      %43 = arith.mulf %27, %13 : vector<8x512xf32>
      %44 = arith.subf %42, %43 : vector<8x512xf32>
      %45 = arith.mulf %27, %10 : vector<8x512xf32>
      %46 = arith.mulf %24, %13 : vector<8x512xf32>
      %47 = arith.addf %45, %46 : vector<8x512xf32>
      %c2_i32_13 = arith.constant 2 : i32
      %48 = arith.muli %c2_i32_12, %c2_i32_13 : i32
      %c0_i32_14 = arith.constant 0 : i32
      %49 = arith.addi %48, %c0_i32_14 : i32
      %50 = arith.index_cast %49 : i32 to index
      %51 = memref.load %arg1[%50] : memref<16xf32, #tpu.memory_space<smem>>
      %52 = vector.broadcast %51 : f32 to vector<8x512xf32>
      %53 = arith.mulf %52, %44 : vector<8x512xf32>
      %54 = arith.addf %41, %53 : vector<8x512xf32>
      %c2_i32_15 = arith.constant 2 : i32
      %55 = arith.muli %c2_i32_12, %c2_i32_15 : i32
      %c0_i32_16 = arith.constant 0 : i32
      %56 = arith.addi %55, %c0_i32_16 : i32
      %57 = arith.index_cast %56 : i32 to index
      %58 = memref.load %arg2[%57] : memref<16xf32, #tpu.memory_space<smem>>
      %59 = vector.broadcast %58 : f32 to vector<8x512xf32>
      %60 = arith.mulf %59, %47 : vector<8x512xf32>
      %61 = arith.addf %54, %60 : vector<8x512xf32>
      %c3_i32 = arith.constant 3 : i32
      %62 = arith.mulf %44, %10 : vector<8x512xf32>
      %63 = arith.mulf %47, %13 : vector<8x512xf32>
      %64 = arith.subf %62, %63 : vector<8x512xf32>
      %65 = arith.mulf %47, %10 : vector<8x512xf32>
      %66 = arith.mulf %44, %13 : vector<8x512xf32>
      %67 = arith.addf %65, %66 : vector<8x512xf32>
      %c2_i32_17 = arith.constant 2 : i32
      %68 = arith.muli %c3_i32, %c2_i32_17 : i32
      %c0_i32_18 = arith.constant 0 : i32
      %69 = arith.addi %68, %c0_i32_18 : i32
      %70 = arith.index_cast %69 : i32 to index
      %71 = memref.load %arg1[%70] : memref<16xf32, #tpu.memory_space<smem>>
      %72 = vector.broadcast %71 : f32 to vector<8x512xf32>
      %73 = arith.mulf %72, %64 : vector<8x512xf32>
      %74 = arith.addf %61, %73 : vector<8x512xf32>
      %c2_i32_19 = arith.constant 2 : i32
      %75 = arith.muli %c3_i32, %c2_i32_19 : i32
      %c0_i32_20 = arith.constant 0 : i32
      %76 = arith.addi %75, %c0_i32_20 : i32
      %77 = arith.index_cast %76 : i32 to index
      %78 = memref.load %arg2[%77] : memref<16xf32, #tpu.memory_space<smem>>
      %79 = vector.broadcast %78 : f32 to vector<8x512xf32>
      %80 = arith.mulf %79, %67 : vector<8x512xf32>
      %81 = arith.addf %74, %80 : vector<8x512xf32>
      %c3_i32_21 = arith.constant 3 : i32
      %cst_22 = arith.constant 0.897597908 : f32
      %82 = vector.broadcast %cst_22 : f32 to vector<8x512xf32>
      %83 = arith.mulf %82, %6 : vector<8x512xf32>
      %84 = math.cos %83 : vector<8x512xf32>
      %cst_23 = arith.constant 0.897597908 : f32
      %85 = vector.broadcast %cst_23 : f32 to vector<8x512xf32>
      %86 = arith.mulf %85, %6 : vector<8x512xf32>
      %87 = math.sin %86 : vector<8x512xf32>
      %c1 = arith.constant 1 : index
      %88 = memref.load %arg1[%c1] : memref<16xf32, #tpu.memory_space<smem>>
      %89 = vector.broadcast %88 : f32 to vector<8x512xf32>
      %90 = arith.mulf %89, %84 : vector<8x512xf32>
      %91 = arith.addf %81, %90 : vector<8x512xf32>
      %c1_24 = arith.constant 1 : index
      %92 = memref.load %arg2[%c1_24] : memref<16xf32, #tpu.memory_space<smem>>
      %93 = vector.broadcast %92 : f32 to vector<8x512xf32>
      %94 = arith.mulf %93, %87 : vector<8x512xf32>
      %95 = arith.addf %91, %94 : vector<8x512xf32>
      %c1_i32_25 = arith.constant 1 : i32
      %96 = arith.mulf %84, %84 : vector<8x512xf32>
      %97 = arith.mulf %87, %87 : vector<8x512xf32>
      %98 = arith.subf %96, %97 : vector<8x512xf32>
      %99 = arith.mulf %87, %84 : vector<8x512xf32>
      %100 = arith.mulf %84, %87 : vector<8x512xf32>
      %101 = arith.addf %99, %100 : vector<8x512xf32>
      %c2_i32_26 = arith.constant 2 : i32
      %102 = arith.muli %c1_i32_25, %c2_i32_26 : i32
      %c1_i32_27 = arith.constant 1 : i32
      %103 = arith.addi %102, %c1_i32_27 : i32
      %104 = arith.index_cast %103 : i32 to index
      %105 = memref.load %arg1[%104] : memref<16xf32, #tpu.memory_space<smem>>
      %106 = vector.broadcast %105 : f32 to vector<8x512xf32>
      %107 = arith.mulf %106, %98 : vector<8x512xf32>
      %108 = arith.addf %95, %107 : vector<8x512xf32>
      %c2_i32_28 = arith.constant 2 : i32
      %109 = arith.muli %c1_i32_25, %c2_i32_28 : i32
      %c1_i32_29 = arith.constant 1 : i32
      %110 = arith.addi %109, %c1_i32_29 : i32
      %111 = arith.index_cast %110 : i32 to index
      %112 = memref.load %arg2[%111] : memref<16xf32, #tpu.memory_space<smem>>
      %113 = vector.broadcast %112 : f32 to vector<8x512xf32>
      %114 = arith.mulf %113, %101 : vector<8x512xf32>
      %115 = arith.addf %108, %114 : vector<8x512xf32>
      %c2_i32_30 = arith.constant 2 : i32
      %116 = arith.mulf %98, %84 : vector<8x512xf32>
      %117 = arith.mulf %101, %87 : vector<8x512xf32>
      %118 = arith.subf %116, %117 : vector<8x512xf32>
      %119 = arith.mulf %101, %84 : vector<8x512xf32>
      %120 = arith.mulf %98, %87 : vector<8x512xf32>
      %121 = arith.addf %119, %120 : vector<8x512xf32>
      %c2_i32_31 = arith.constant 2 : i32
      %122 = arith.muli %c2_i32_30, %c2_i32_31 : i32
      %c1_i32_32 = arith.constant 1 : i32
      %123 = arith.addi %122, %c1_i32_32 : i32
      %124 = arith.index_cast %123 : i32 to index
      %125 = memref.load %arg1[%124] : memref<16xf32, #tpu.memory_space<smem>>
      %126 = vector.broadcast %125 : f32 to vector<8x512xf32>
      %127 = arith.mulf %126, %118 : vector<8x512xf32>
      %128 = arith.addf %115, %127 : vector<8x512xf32>
      %c2_i32_33 = arith.constant 2 : i32
      %129 = arith.muli %c2_i32_30, %c2_i32_33 : i32
      %c1_i32_34 = arith.constant 1 : i32
      %130 = arith.addi %129, %c1_i32_34 : i32
      %131 = arith.index_cast %130 : i32 to index
      %132 = memref.load %arg2[%131] : memref<16xf32, #tpu.memory_space<smem>>
      %133 = vector.broadcast %132 : f32 to vector<8x512xf32>
      %134 = arith.mulf %133, %121 : vector<8x512xf32>
      %135 = arith.addf %128, %134 : vector<8x512xf32>
      %c3_i32_35 = arith.constant 3 : i32
      %136 = arith.mulf %118, %84 : vector<8x512xf32>
      %137 = arith.mulf %121, %87 : vector<8x512xf32>
      %138 = arith.subf %136, %137 : vector<8x512xf32>
      %139 = arith.mulf %121, %84 : vector<8x512xf32>
      %140 = arith.mulf %118, %87 : vector<8x512xf32>
      %141 = arith.addf %139, %140 : vector<8x512xf32>
      %c2_i32_36 = arith.constant 2 : i32
      %142 = arith.muli %c3_i32_35, %c2_i32_36 : i32
      %c1_i32_37 = arith.constant 1 : i32
      %143 = arith.addi %142, %c1_i32_37 : i32
      %144 = arith.index_cast %143 : i32 to index
      %145 = memref.load %arg1[%144] : memref<16xf32, #tpu.memory_space<smem>>
      %146 = vector.broadcast %145 : f32 to vector<8x512xf32>
      %147 = arith.mulf %146, %138 : vector<8x512xf32>
      %148 = arith.addf %135, %147 : vector<8x512xf32>
      %c2_i32_38 = arith.constant 2 : i32
      %149 = arith.muli %c3_i32_35, %c2_i32_38 : i32
      %c1_i32_39 = arith.constant 1 : i32
      %150 = arith.addi %149, %c1_i32_39 : i32
      %151 = arith.index_cast %150 : i32 to index
      %152 = memref.load %arg2[%151] : memref<16xf32, #tpu.memory_space<smem>>
      %153 = vector.broadcast %152 : f32 to vector<8x512xf32>
      %154 = arith.mulf %153, %141 : vector<8x512xf32>
      %155 = arith.addf %148, %154 : vector<8x512xf32>
      %c4_i32 = arith.constant 4 : i32
      %156 = arith.mulf %138, %84 : vector<8x512xf32>
      %157 = arith.mulf %141, %87 : vector<8x512xf32>
      %158 = arith.subf %156, %157 : vector<8x512xf32>
      %159 = arith.mulf %141, %84 : vector<8x512xf32>
      %160 = arith.mulf %138, %87 : vector<8x512xf32>
      %161 = arith.addf %159, %160 : vector<8x512xf32>
      %c2_i32_40 = arith.constant 2 : i32
      %162 = arith.muli %c4_i32, %c2_i32_40 : i32
      %c1_i32_41 = arith.constant 1 : i32
      %163 = arith.addi %162, %c1_i32_41 : i32
      %164 = arith.index_cast %163 : i32 to index
      %165 = memref.load %arg1[%164] : memref<16xf32, #tpu.memory_space<smem>>
      %166 = vector.broadcast %165 : f32 to vector<8x512xf32>
      %167 = arith.mulf %166, %158 : vector<8x512xf32>
      %168 = arith.addf %155, %167 : vector<8x512xf32>
      %c2_i32_42 = arith.constant 2 : i32
      %169 = arith.muli %c4_i32, %c2_i32_42 : i32
      %c1_i32_43 = arith.constant 1 : i32
      %170 = arith.addi %169, %c1_i32_43 : i32
      %171 = arith.index_cast %170 : i32 to index
      %172 = memref.load %arg2[%171] : memref<16xf32, #tpu.memory_space<smem>>
      %173 = vector.broadcast %172 : f32 to vector<8x512xf32>
      %174 = arith.mulf %173, %161 : vector<8x512xf32>
      %175 = arith.addf %168, %174 : vector<8x512xf32>
      %c5_i32 = arith.constant 5 : i32
      %176 = arith.mulf %158, %84 : vector<8x512xf32>
      %177 = arith.mulf %161, %87 : vector<8x512xf32>
      %178 = arith.subf %176, %177 : vector<8x512xf32>
      %179 = arith.mulf %161, %84 : vector<8x512xf32>
      %180 = arith.mulf %158, %87 : vector<8x512xf32>
      %181 = arith.addf %179, %180 : vector<8x512xf32>
      %c2_i32_44 = arith.constant 2 : i32
      %182 = arith.muli %c5_i32, %c2_i32_44 : i32
      %c1_i32_45 = arith.constant 1 : i32
      %183 = arith.addi %182, %c1_i32_45 : i32
      %184 = arith.index_cast %183 : i32 to index
      %185 = memref.load %arg1[%184] : memref<16xf32, #tpu.memory_space<smem>>
      %186 = vector.broadcast %185 : f32 to vector<8x512xf32>
      %187 = arith.mulf %186, %178 : vector<8x512xf32>
      %188 = arith.addf %175, %187 : vector<8x512xf32>
      %c2_i32_46 = arith.constant 2 : i32
      %189 = arith.muli %c5_i32, %c2_i32_46 : i32
      %c1_i32_47 = arith.constant 1 : i32
      %190 = arith.addi %189, %c1_i32_47 : i32
      %191 = arith.index_cast %190 : i32 to index
      %192 = memref.load %arg2[%191] : memref<16xf32, #tpu.memory_space<smem>>
      %193 = vector.broadcast %192 : f32 to vector<8x512xf32>
      %194 = arith.mulf %193, %181 : vector<8x512xf32>
      %195 = arith.addf %188, %194 : vector<8x512xf32>
      %c6_i32 = arith.constant 6 : i32
      %196 = arith.mulf %178, %84 : vector<8x512xf32>
      %197 = arith.mulf %181, %87 : vector<8x512xf32>
      %198 = arith.subf %196, %197 : vector<8x512xf32>
      %199 = arith.mulf %181, %84 : vector<8x512xf32>
      %200 = arith.mulf %178, %87 : vector<8x512xf32>
      %201 = arith.addf %199, %200 : vector<8x512xf32>
      %c2_i32_48 = arith.constant 2 : i32
      %202 = arith.muli %c6_i32, %c2_i32_48 : i32
      %c1_i32_49 = arith.constant 1 : i32
      %203 = arith.addi %202, %c1_i32_49 : i32
      %204 = arith.index_cast %203 : i32 to index
      %205 = memref.load %arg1[%204] : memref<16xf32, #tpu.memory_space<smem>>
      %206 = vector.broadcast %205 : f32 to vector<8x512xf32>
      %207 = arith.mulf %206, %198 : vector<8x512xf32>
      %208 = arith.addf %195, %207 : vector<8x512xf32>
      %c2_i32_50 = arith.constant 2 : i32
      %209 = arith.muli %c6_i32, %c2_i32_50 : i32
      %c1_i32_51 = arith.constant 1 : i32
      %210 = arith.addi %209, %c1_i32_51 : i32
      %211 = arith.index_cast %210 : i32 to index
      %212 = memref.load %arg2[%211] : memref<16xf32, #tpu.memory_space<smem>>
      %213 = vector.broadcast %212 : f32 to vector<8x512xf32>
      %214 = arith.mulf %213, %201 : vector<8x512xf32>
      %215 = arith.addf %208, %214 : vector<8x512xf32>
      %c7_i32 = arith.constant 7 : i32
      %216 = arith.mulf %198, %84 : vector<8x512xf32>
      %217 = arith.mulf %201, %87 : vector<8x512xf32>
      %218 = arith.subf %216, %217 : vector<8x512xf32>
      %219 = arith.mulf %201, %84 : vector<8x512xf32>
      %220 = arith.mulf %198, %87 : vector<8x512xf32>
      %221 = arith.addf %219, %220 : vector<8x512xf32>
      %c2_i32_52 = arith.constant 2 : i32
      %222 = arith.muli %c7_i32, %c2_i32_52 : i32
      %c1_i32_53 = arith.constant 1 : i32
      %223 = arith.addi %222, %c1_i32_53 : i32
      %224 = arith.index_cast %223 : i32 to index
      %225 = memref.load %arg1[%224] : memref<16xf32, #tpu.memory_space<smem>>
      %226 = vector.broadcast %225 : f32 to vector<8x512xf32>
      %227 = arith.mulf %226, %218 : vector<8x512xf32>
      %228 = arith.addf %215, %227 : vector<8x512xf32>
      %c2_i32_54 = arith.constant 2 : i32
      %229 = arith.muli %c7_i32, %c2_i32_54 : i32
      %c1_i32_55 = arith.constant 1 : i32
      %230 = arith.addi %229, %c1_i32_55 : i32
      %231 = arith.index_cast %230 : i32 to index
      %232 = memref.load %arg2[%231] : memref<16xf32, #tpu.memory_space<smem>>
      %233 = vector.broadcast %232 : f32 to vector<8x512xf32>
      %234 = arith.mulf %233, %221 : vector<8x512xf32>
      %235 = arith.addf %228, %234 : vector<8x512xf32>
      %c7_i32_56 = arith.constant 7 : i32
      %236 = arith.index_cast %4 : i32 to index
      %c0_57 = arith.constant 0 : index
      %237 = vector.load %arg4[%236, %c0_57] : memref<64x512xf32, #tpu.memory_space<vmem>>, vector<8x512xf32>
      tpu.vector_store %arg4[%236, %c0_57], %235 {strides = array<i32>} : memref<64x512xf32, #tpu.memory_space<vmem>>, vector<8x512xf32>,
    }
    %c8_i32_0 = arith.constant 8 : i32
    return
  }
  func.func @transform_0(%arg0: i32) -> i32 {
    %c0_i32 = arith.constant 0 : i32
    %c0_i32_0 = arith.constant 0 : i32
    return %c0_i32 : i32
  }
  func.func @transform_1(%arg0: i32) -> i32 {
    %c0_i32 = arith.constant 0 : i32
    %c0_i32_0 = arith.constant 0 : i32
    return %c0_i32 : i32
  }
  func.func @transform_2(%arg0: i32) -> (i32, i32) {
    %c0_i32 = arith.constant 0 : i32
    %c0_i32_0 = arith.constant 0 : i32
    return %arg0, %c0_i32 : i32, i32
  }
  func.func @transform_3(%arg0: i32) -> (i32, i32) {
    %c0_i32 = arith.constant 0 : i32
    %c0_i32_0 = arith.constant 0 : i32
    return %arg0, %c0_i32 : i32, i32
  }
}

</mosaic_0001>

<bundles_post_ra>
// kernel: tpu_custom_call.1
= control target key start
LH: loop header
LB: loop body
LE: loop exit
PB: predicated region body
PF: predicated region fallthrough
CT: control target
= control target key end

     0   :  { %8 = vsyncpa [#allocation5], 0  ;;  %s3871_s0 = inlined_call_operand.hbm [shape: f32[16], index: 0, kind: input, shape index: {}]   ;;  %s3872_s1 = inlined_call_operand.vmem [shape: f32[16], index: 1, kind: input, shape index: {}]   ;;  %s3873_s2 = inlined_call_operand.hbm [shape: f32[64,512], index: 2, kind: input, shape index: {}]   ;;  %s3874_s3 = inlined_call_operand.hbm [shape: f32[64,512], index: 3, kind: output, shape index: {}]  }
   0x1   :  { %9 = vsyncpa [#allocation6], 0 }
   0x2   :  { %10 = vsyncpa [#allocation3], 0 }
   0x3   :  { %11 = vsyncpa [#allocation4], 0  ;;  %s26_s14 = sshll.u32 %s3872_s1, 4  ;;  %s2416_s17 = scalar_lea.hbm %s3871_s0, 16  ;;  %s27_s14 = int_to_ptr.vmem [resolvable:$true] %s26_s14 }
   0x4   :  { %p2417_p0 = scmp.ne.s32.totalorder %s3871_s0, %s2416_s17  ;;  %p2420_p1 = scmp.lt.u32.totalorder %s2416_s17, %s3871_s0 }
   0x6   :  { %p2422_p2 = pnand %p2420_p1, %p2417_p0 }
   0x8   :  { %2425 = shalt.err (!%p2422_p2)
}
   0x9   :  { %s2498_s22 = smov [#allocation2]   ;;  %s2426_s1 = scalar_lea.vmem %s27_s14, 16 }
   0xa   :  { %19 = dma.hbm_to_smem %s3871_s0, 16, %s2498_s22, [#allocation5]  }
   0xb   :  { %p2427_p3 = scmp.ne.s32.totalorder %s27_s14, %s2426_s1  ;;  %p2431_p4 = scmp.lt.s32.totalorder %s27_s14, %s27_s14 }
   0xc   :  { %p2432_p5 = scmp.lt.s32.totalorder %s2426_s1, %s2426_s1 }
   0xe   :  { %p2433_p6 = por %p2432_p5, %p2431_p4 }
  0x10   :  { %p2434_p7 = pnand %p2433_p6, %p2427_p3 }
  0x12   :  { %2437 = shalt.err (!%p2434_p7)
}
  0x13   :  { %s2499_s25 = smov [#allocation7]   ;;  %s2500_s26 = smov [#allocation8]  }
  0x14   :  { %29 = dma.vmem_to_smem %s27_s14, 16, %s2499_s25, [#allocation6]  }
  0x15   :  { %s35_s27 = sshll.u32 %s2500_s26, 4  ;;  %s2438_s30 = scalar_lea.hbm %s3873_s2, 4096  ;;  %s36_s27 = int_to_ptr.vmem [resolvable:$true] %s35_s27 }
  0x16   :  { %p2439_p8 = scmp.ne.s32.totalorder %s3873_s2, %s2438_s30  ;;  %p2442_p9 = scmp.lt.u32.totalorder %s2438_s30, %s3873_s2 }
  0x18   :  { %p2444_p10 = pnand %p2442_p9, %p2439_p8 }
  0x1a   :  { %2447 = shalt.err (!%p2444_p10)
}
  0x1b   :  { %s2448_s7 = scalar_lea.vmem %s36_s27, 4096  ;;  %p2453_p12 = scmp.lt.s32.totalorder %s36_s27, %s36_s27 }
  0x1c   :  { %p2449_p11 = scmp.ne.s32.totalorder %s36_s27, %s2448_s7  ;;  %p2454_p13 = scmp.lt.s32.totalorder %s2448_s7, %s2448_s7 }
  0x1e   :  { %p2455_p0 = por %p2454_p13, %p2453_p12 }
  0x20   :  { %p2456_p1 = pnand %p2455_p0, %p2449_p11 }
  0x22   :  { %2459 = shalt.err (!%p2456_p1)
}
  0x23   :  { %s2501_s8 = smov 512   ;;  %s2502_s9 = smov 32  }
  0x24   :  { %41 = dma.hbm_to_vmem [thread:$0]  %s3873_s2, 4096, %s36_s27, [#allocation3], %s2501_s8, %s2501_s8, %s2502_s9  }
  0x25   :  { %2486 = dma.done.wait [#allocation5], 16  }
  0x26   :  { %2487 = vsyncadd [#allocation5], 4294967280 }
  0x27   :  { %2488 = dma.done.wait [#allocation6], 16  }
  0x28   :  { %2489 = vsyncadd [#allocation6], 4294967280 }
  0x29   :  { %2490 = dma.done.wait [#allocation3], 4096  }
  0x2a   :  { %2491 = vsyncadd [#allocation3], 4294963200 }
  0x2b   :  { %51 = sfence }
  0x2c   :  { %s2560_s12 = smov 0  }
  0x2d LB: > { %s2238_s13 = sshll.u32 %s2496_s12, 3  ;;  %v2503_v33 = vmov 683565275   ;;  %v2504_v35 = vmov 2475754826   ;;  %s2875_s16 = sld [smem:[#allocation2]]  ;;  %s2496_s12 = sphi %s2560_s12, %s57_s12  }
  0x2e   : > { %s2566_s14 = sshra.s32 %s2238_s13, 3  ;;  %v2505_v37 = vmov 2131351028   ;;  %v2506_v39 = vmov 2102212464   ;;  %s2881_s17 = sld [smem:[#allocation7]] }
  0x2f   : > { %s2328_s2 = sshll.u32 %s2566_s14, 5  ;;  %v2507_v41 = vmov 920167782   ;;  %v2508_v49 = vmov 1326507024   ;;  %s2922_s18 = sld [smem:[#allocation2 + $0x2]] }
  0x30   : > { %s2571_s15 = scalar_lea.vmem [#allocation8], %s2328_s2  ;;  %s2937_s19 = sld [smem:[#allocation7 + $0x2]] }
  0x31   : > { %v2574_v0 = vld [vmem:[%s2571_s15] sm:$0xff]  ;;  %v65_v1 = vld [vmem:[%s2571_s15 + $0x8] sm:$0xff]  ;;  %v66_v2 = vld [vmem:[%s2571_s15 + $0x10] sm:$0xff]  ;;  %s2939_s20 = sld [smem:[#allocation2 + $0x4]]  ;;  %s3065_s22 = sld [smem:[#allocation2 + $0x6]] }
  0x32   : > { %v2579_v3 = vmul.f32 2.0943952, %v2574_v0  ;;  %v2581_v4 = vmul.f32 2.0943952, %v65_v1  ;;  %v2583_v5 = vmul.f32 2.0943952, %v66_v2 }
  0x33   : > { %s3004_s21 = sld [smem:[#allocation7 + $0x4]]  ;;  %s3070_s23 = sld [smem:[#allocation7 + $0x6]] }
  0x34   : > { %v72_v6 = vand.u32 2147483647, %v2579_v3  ;;  %v75_v7 = vand.u32 2139095040, %v2579_v3  ;;  %v175_v8 = vand.u32 2147483647, %v2581_v4  ;;  %v178_v9 = vand.u32 2139095040, %v2581_v4 }
  0x35   : > { %v281_v14 = vand.u32 2139095040, %v2583_v5  ;;  %v278_v27 = vand.u32 2147483647, %v2583_v5  ;;  %s3373_s24 = sld [smem:[#allocation2 + $0x1]]  ;;  %s3476_s25 = sld [smem:[#allocation2 + $0x3]] }
  0x36   : > { %v76_v10 = vshrl.u32 %v75_v7, 23  ;;  %v79_v11 = vand.u32 8388607, %v72_v6  ;;  %v179_v12 = vshrl.u32 %v178_v9, 23  ;;  %v182_v13 = vand.u32 8388607, %v175_v8 }
  0x37   : > { %v282_v17 = vshrl.u32 %v281_v14, 23  ;;  %s3405_s1 = sld [smem:[#allocation7 + $0x1]]  ;;  %s3497_s26 = sld [smem:[#allocation7 + $0x3]] }
  0x38   : > { %v2241_v15 = vadd.s32 4294967169, %v76_v10  ;;  %v2245_v16 = vadd.s32 4294967169, %v179_v12  ;;  %v80_v19 = vor.u32 8388608, %v79_v11  ;;  %v183_v20 = vor.u32 8388608, %v182_v13  ;;  %s3547_s27 = sld [smem:[#allocation2 + $0x5]]  ;;  %s3580_s29 = sld [smem:[#allocation2 + $0x7]] }
  0x39   : > { %v2249_v22 = vadd.s32 4294967169, %v282_v17  ;;  %s3549_s28 = sld [smem:[#allocation7 + $0x5]]  ;;  %s3592_s30 = sld [smem:[#allocation7 + $0x7]] }
  0x3a   : > { %v82_v18 = vadd.s32 1, %v2241_v15  ;;  %v185_v21 = vadd.s32 1, %v2245_v16  ;;  %v2595_v28 = vshll.u32 %v80_v19, 8  ;;  %v2597_v30 = vshll.u32 %v183_v20, 8  ;;  %s3648_s4 = sld [smem:[#allocation2 + $0x9]]  ;;  %s3754_s0 = sld [smem:[#allocation2 + $0xb]] }
  0x3b   : > { %v2599_v31 = vadd.s32 1, %v2249_v22  ;;  %s3650_s5 = sld [smem:[#allocation7 + $0x9]]  ;;  %s3765_s6 = sld [smem:[#allocation7 + $0xb]] }
  0x3c   : > { %vm83_vm0 = vcmp.gt.s32.totalorder %v82_v18, 0  ;;  %vm186_vm1 = vcmp.gt.s32.totalorder %v185_v21, 0  ;;  %s3801_s7 = sld [smem:[#allocation2 + $0xd]]  ;;  %s3829_s11 = sld [smem:[#allocation2 + $0xf]] }
  0x3d   : > { %v84_v23 = vsel %vm83_vm0, %v82_v18, 0  ;;  %v187_v26 = vsel %vm186_vm1, %v185_v21, 0  ;;  %vm289_vm6 = vcmp.gt.s32.totalorder %v2599_v31, 0  ;;  %s3809_s10 = sld [smem:[#allocation7 + $0xd]]  ;;  %s3831_s13 = sld [smem:[#allocation7 + $0xf]] }
  0x3e   : > { %v85_v24 = vshrl.u32 %v84_v23, 5  ;;  %v86_v25 = vand.u32 31, %v84_v23  ;;  %v189_v29 = vand.u32 31, %v187_v26  ;;  %v2606_v43 = vshrl.u32 %v187_v26, 5  ;;  %s57_s12 = sadd.s32 1, %s2496_s12  }
  0x3f   : > { %p54_p2 = scmp.ge.s32.totalorder %s57_s12, 8  }
  0x40   : > { %v87_v32 = vsub.s32 32, %v86_v25  ;;  %v89_v34 = vshll.u32 %v2503_v33, %v86_v25  ;;  %v92_v36 = vshll.u32 %v2504_v35, %v86_v25  ;;  %v95_v38 = vshll.u32 %v2505_v37, %v86_v25 }
  0x41   : > { %v98_v40 = vshll.u32 %v2506_v39, %v86_v25  ;;  %v101_v42 = vshll.u32 %v2507_v41, %v86_v25  ;;  %vm104_vm2 = vcmp.lt.s32.totalorder %v85_v24, 1  ;;  %vm105_vm3 = vcmp.lt.s32.totalorder %v85_v24, 2 }
  0x42   : > { %v88_v44 = vshrl.u32 %v2503_v33, %v87_v32  ;;  %v90_v45 = vshrl.u32 %v2504_v35, %v87_v32  ;;  %v93_v46 = vshrl.u32 %v2505_v37, %v87_v32  ;;  %v96_v47 = vshrl.u32 %v2506_v39, %v87_v32 }
  0x43   : > { %v99_v48 = vshrl.u32 %v2507_v41, %v87_v32  ;;  %v102_v50 = vshrl.u32 %v2508_v49, %v87_v32  ;;  %vm107_vm4 = vcmp.lt.s32.totalorder %v85_v24, 4  ;;  %v190_v54 = vsub.s32 32, %v189_v29 }
  0x44   : > { %v91_v51 = vor.u32 %v90_v45, %v89_v34  ;;  %v94_v52 = vor.u32 %v93_v46, %v92_v36  ;;  %v97_v53 = vor.u32 %v96_v47, %v95_v38  ;;  %vm106_vm5 = vcmp.lt.s32.totalorder %v85_v24, 3 }
  0x45   : > { %v100_v55 = vor.u32 %v99_v48, %v98_v40  ;;  %v103_v56 = vor.u32 %v102_v50, %v101_v42  ;;  %v192_v57 = vshll.u32 %v2503_v33, %v189_v29  ;;  %v195_v2 = vshll.u32 %v2504_v35, %v189_v29  ;;  %v2651_v48 = vld [vmem:[%s2571_s15 + $0x18] sm:$0xff] }
  0x46   : > { %v108_v58 = vsel %vm104_vm2, %v88_v44, %v91_v51  ;;  %v109_v59 = vsel %vm107_vm4, %v97_v53, 2102212464  ;;  %v112_v60 = vsel %vm104_vm2, %v91_v51, %v94_v52  ;;  %v116_v61 = vsel %vm104_vm2, %v94_v52, %v97_v53 }
  0x47   : > { %v110_v62 = vsel %vm106_vm5, %v94_v52, %v109_v59  ;;  %v113_v63 = vsel %vm107_vm4, %v100_v55, 920167782  ;;  %v117_v1 = vsel %vm107_vm4, %v103_v56, 1326507024  ;;  %v191_v10 = vshrl.u32 %v2503_v33, %v190_v54 }
  0x48   : > { %v114_v7 = vsel %vm106_vm5, %v97_v53, %v113_v63  ;;  %v118_v9 = vsel %vm106_vm5, %v100_v55, %v117_v1  ;;  %v193_v11 = vshrl.u32 %v2504_v35, %v190_v54  ;;  %v111_v12 = vsel %vm105_vm3, %v108_v58, %v110_v62 }
  0x49   : > { %v115_v13 = vsel %vm105_vm3, %v112_v60, %v114_v7  ;;  %v119_v14 = vsel %vm105_vm3, %v116_v61, %v118_v9  ;;  %v196_v15 = vshrl.u32 %v2505_v37, %v190_v54  ;;  %v198_v22 = vshll.u32 %v2505_v37, %v189_v29 }
  0x4a   : > { %v2627_v16 = vmul.u32.u64.low %v2595_v28, %v119_v14  ;;  %v2628_v17 = vmul.u32.u64.high %v2595_v28, %v119_v14, %v2627_v16  ;;  %v2631_v18 = vmul.u32.u64.low %v2595_v28, %v115_v13  ;;  %v2632_v19 = vmul.u32.u64.high %v2595_v28, %v115_v13, %v2631_v18 }
  0x4b   : > { %v194_v20 = vor.u32 %v193_v11, %v192_v57  ;;  %v197_v21 = vor.u32 %v196_v15, %v195_v2  ;;  %v199_v23 = vshrl.u32 %v2506_v39, %v190_v54  ;;  %v201_v24 = vshll.u32 %v2506_v39, %v189_v29 }
  0x4c   : > { %v202_v25 = vshrl.u32 %v2507_v41, %v190_v54  ;;  %v204_v26 = vshll.u32 %v2507_v41, %v189_v29  ;;  %v205_v32 = vshrl.u32 %v2508_v49, %v190_v54  ;;  %v127_v34 = vmul.u32 %v2595_v28, %v111_v12 }
  0x4d   : > { %v200_v36 = vor.u32 %v199_v23, %v198_v22  ;;  %vm207_vm7 = vcmp.lt.s32.totalorder %v2606_v43, 1  ;;  %vm208_vm8 = vcmp.lt.s32.totalorder %v2606_v43, 2  ;;  %vm129_vm9 = vc.u32 %v2628_v17, %v2631_v18 }
  0x4e   : > { %v130_v38 = vadd.s32 1, %v2632_v19  ;;  %v203_v40 = vor.u32 %v202_v25, %v201_v24  ;;  %vm209_vm10 = vcmp.lt.s32.totalorder %v2606_v43, 3  ;;  %v206_v42 = vor.u32 %v205_v32, %v204_v26 }
  0x4f   : > { %vm210_vm11 = vcmp.lt.s32.totalorder %v2606_v43, 4  ;;  %v211_v29 = vsel %vm207_vm7, %v191_v10, %v194_v20  ;;  %v215_v44 = vsel %vm207_vm7, %v194_v20, %v197_v21  ;;  %v219_v47 = vsel %vm207_vm7, %v197_v21, %v200_v36 }
  0x50   : > { %v131_v28 = vsel %vm129_vm9, %v130_v38, %v2632_v19  ;;  %v212_v45 = vsel %vm210_vm11, %v200_v36, 2102212464  ;;  %v216_v46 = vsel %vm210_vm11, %v203_v40, 920167782  ;;  %v220_v53 = vsel %vm210_vm11, %v206_v42, 1326507024 }
  0x51   : > { %v132_v50 = vadd.s32 %v131_v28, %v127_v34  ;;  %v213_v51 = vsel %vm209_vm10, %v197_v21, %v212_v45  ;;  %v217_v52 = vsel %vm209_vm10, %v200_v36, %v216_v46  ;;  %v221_v56 = vsel %vm209_vm10, %v203_v40, %v220_v53 }
  0x52   : > { %v214_v54 = vsel %vm208_vm8, %v211_v29, %v213_v51  ;;  %v218_v55 = vsel %vm208_vm8, %v215_v44, %v217_v52  ;;  %v290_v57 = vsel %vm289_vm6, %v2599_v31, 0  ;;  %v222_v59 = vsel %vm208_vm8, %v219_v47, %v221_v56 }
  0x53   : > { %v133_v58 = vadd.s32 536870912, %v132_v50  ;;  %v2669_v60 = vmul.u32.u64.low %v2597_v30, %v218_v55  ;;  %v2670_v61 = vmul.u32.u64.high %v2597_v30, %v218_v55, %v2669_v60  ;;  %v2674_v62 = vmul.f32 2.0943952, %v2651_v48 }
  0x54   : > { %v2677_v63 = vmul.u32.u64.low %v2597_v30, %v222_v59  ;;  %v2678_v1 = vmul.u32.u64.high %v2597_v30, %v222_v59, %v2677_v63  ;;  %v285_v2 = vand.u32 8388607, %v278_v27  ;;  %v292_v7 = vand.u32 31, %v290_v57 }
  0x55   : > { %v2682_v31 = vshrl.u32 %v133_v58, 30  ;;  %v230_v43 = vmul.u32 %v2597_v30, %v214_v54  ;;  %v233_v10 = vadd.s32 1, %v2670_v61  ;;  %v384_v13 = vand.u32 2139095040, %v2674_v62 }
  0x56   : > { %v293_v11 = vsub.s32 32, %v292_v7  ;;  %vm232_vm12 = vc.u32 %v2678_v1, %v2669_v60  ;;  %v286_v12 = vor.u32 8388608, %v285_v2  ;;  %v291_v16 = vshrl.u32 %v290_v57, 5 }
  0x57   : > { %v135_v9 = vshll.u32 %v2682_v31, 30  ;;  %v234_v15 = vsel %vm232_vm12, %v233_v10, %v2670_v61  ;;  %v295_v20 = vshll.u32 %v2503_v33, %v292_v7  ;;  %v298_v21 = vshll.u32 %v2504_v35, %v292_v7 }
  0x58   : > { %v235_v19 = vadd.s32 %v234_v15, %v230_v43  ;;  %v296_v30 = vshrl.u32 %v2504_v35, %v293_v11  ;;  %v299_v23 = vshrl.u32 %v2505_v37, %v293_v11  ;;  %v301_v24 = vshll.u32 %v2505_v37, %v292_v7 }
  0x59   : > { %v136_v14 = vsub.s32 %v132_v50, %v135_v9  ;;  %v302_v25 = vshrl.u32 %v2506_v39, %v293_v11  ;;  %v304_v32 = vshll.u32 %v2506_v39, %v292_v7  ;;  %v2698_v34 = vshll.u32 %v286_v12, 8 }
  0x5a   : > { %v236_v26 = vadd.s32 536870912, %v235_v19  ;;  %v385_v36 = vshrl.u32 %v384_v13, 23  ;;  %v128_v38 = vadd.s32 %v2631_v18, %v2628_v17  ;;  %v294_v42 = vshrl.u32 %v2503_v33, %v293_v11 }
  0x5b   : > { %v138_v22 = vsub.s32 0, %v136_v14  ;;  %vm313_vm13 = vcmp.lt.s32.totalorder %v291_v16, 4  ;;  %v297_v44 = vor.u32 %v296_v30, %v295_v20  ;;  %v305_v28 = vshrl.u32 %v2507_v41, %v293_v11 }
  0x5c   : > { %v2703_v29 = vshrl.u32 %v236_v26, 30  ;;  %v307_v45 = vshll.u32 %v2507_v41, %v292_v7  ;;  %v300_v47 = vor.u32 %v299_v23, %v298_v21  ;;  %v303_v50 = vor.u32 %v302_v25, %v301_v24 }
  0x5d   : > { %v2242_v40 = vmin.u32 %v138_v22, %v136_v14  ;;  %v308_v51 = vshrl.u32 %v2508_v49, %v293_v11  ;;  %v306_v53 = vor.u32 %v305_v28, %v304_v32  ;;  %vm310_vm14 = vcmp.lt.s32.totalorder %v291_v16, 1 }
  0x5e   : > { %v238_v52 = vshll.u32 %v2703_v29, 30  ;;  %vm312_vm15 = vcmp.lt.s32.totalorder %v291_v16, 3  ;;  %v315_v54 = vsel %vm313_vm13, %v303_v50, 2102212464  ;;  %v2253_v55 = vadd.s32 4294967169, %v385_v36 }
  0x5f   : > { %v140_v46 = vclz %v2242_v40  ;;  %v309_v18 = vor.u32 %v308_v51, %v307_v45  ;;  %vm311_vm0 = vcmp.lt.s32.totalorder %v291_v16, 2  ;;  %v314_v57 = vsel %vm310_vm14, %v294_v42, %v297_v44 }
  0x60   : > { %v2710_v56 = vsub.s32 %v235_v19, %v238_v52  ;;  %v319_v58 = vsel %vm313_vm13, %v306_v53, 920167782  ;;  %v318_v59 = vsel %vm310_vm14, %v297_v44, %v300_v47  ;;  %v316_v43 = vsel %vm312_vm15, %v300_v47, %v315_v54 }
  0x61   : > { %v2243_v17 = vadd.s32 4294967294, %v140_v46  ;;  %v320_v61 = vsel %vm312_vm15, %v303_v50, %v319_v58  ;;  %v323_v63 = vsel %vm313_vm13, %v309_v18, 1326507024  ;;  %v322_v9 = vsel %vm310_vm14, %v300_v47, %v303_v50 }
  0x62   : > { %v241_v7 = vsub.s32 0, %v2710_v56  ;;  %v324_v13 = vsel %vm312_vm15, %v306_v53, %v323_v63  ;;  %v321_v19 = vsel %vm311_vm0, %v318_v59, %v320_v61  ;;  %v381_v20 = vand.u32 2147483647, %v2674_v62 }
  0x63   : > { %vm2244_vm1 = vcmp.lt.s32.totalorder %v2243_v17, 0  ;;  %v317_v22 = vsel %vm311_vm0, %v314_v57, %v316_v43  ;;  %v325_v23 = vsel %vm311_vm0, %v322_v9, %v324_v13  ;;  %vm74_vm2 = vcmp.lt.s32.totalorder %v2579_v3, 0 }
  0x64   : > { %v143_v2 = vsel %vm2244_vm1, 0, %v2243_v17  ;;  %v2246_v15 = vmin.u32 %v241_v7, %v2710_v56  ;;  %v2727_v25 = vmul.u32.u64.low %v2698_v34, %v325_v23  ;;  %v2728_v26 = vmul.u32.u64.high %v2698_v34, %v325_v23, %v2727_v25 }
  0x65   : > { %v144_v10 = vsub.s32 32, %v143_v2  ;;  %v145_v11 = vshll.u32 %v136_v14, %v143_v2  ;;  %v148_v12 = vsub.s32 4294967266, %v143_v2  ;;  %v391_v14 = vadd.s32 1, %v2253_v55 }
  0x66   : > { %v243_v24 = vclz %v2246_v15  ;;  %v2731_v40 = vmul.u32.u64.low %v2698_v34, %v321_v19  ;;  %v2732_v42 = vmul.u32.u64.high %v2698_v34, %v321_v19, %v2731_v40  ;;  %v2739_v45 = vand.u32 8388607, %v381_v20 }
  0x67   : > { %v146_v30 = vshrl.u32 %v128_v38, %v144_v10  ;;  %v149_v21 = vadd.s32 127, %v148_v12  ;;  %v158_v38 = vsub.s32 4, %v2682_v31  ;;  %vm392_vm3 = vcmp.gt.s32.totalorder %v391_v14, 0 }
  0x68   : > { %v2247_v44 = vadd.s32 4294967294, %v243_v24  ;;  %v393_v46 = vsel %vm392_vm3, %v391_v14, 0  ;;  %v231_v47 = vadd.s32 %v2669_v60, %v2678_v1  ;;  %v333_v50 = vmul.u32 %v2698_v34, %v317_v22 }
  0x69   : > { %v147_v32 = vor.u32 %v146_v30, %v145_v11  ;;  %v150_v36 = vshll.u32 %v149_v21, 23  ;;  %vm335_vm5 = vc.u32 %v2728_v26, %v2731_v40  ;;  %v336_v53 = vadd.s32 1, %v2732_v42 }
  0x6a   : > { %vm2248_vm4 = vcmp.lt.s32.totalorder %v2247_v44, 0  ;;  %v395_v17 = vand.u32 31, %v393_v46  ;;  %v159_v18 = vsel %vm74_vm2, %v158_v38, %v2682_v31  ;;  %vm2753_vm6 = vcmp.le.f32.partialorder %v72_v6, 0.7853982 }
  0x6b   : > { %v151_v16 = vor.u32 4788187, %v150_v36  ;;  %v154_v28 = vcvt.s32.f32 %v147_v32  ;;  %v246_v52 = vsel %vm2248_vm4, 0, %v2247_v44  ;;  %v337_v34 = vsel %vm335_vm5, %v336_v53, %v2732_v42 }
  0x6c   : > { %v247_v54 = vsub.s32 32, %v246_v52  ;;  %v248_v55 = vshll.u32 %v2710_v56, %v246_v52  ;;  %v251_v57 = vsub.s32 4294967266, %v246_v52  ;;  %v396_v58 = vsub.s32 32, %v395_v17 }
  0x6d   : > { %v152_v51 = vand.u32 2147483647, %v151_v16  ;;  %vm177_vm7 = vcmp.lt.s32.totalorder %v2581_v4, 0  ;;  %v338_v63 = vadd.s32 %v337_v34, %v333_v50  ;;  %v389_v31 = vor.u32 8388608, %v2739_v45 }
  0x6e   : > { %v249_v59 = vshrl.u32 %v231_v47, %v247_v54  ;;  %v252_v61 = vadd.s32 127, %v251_v57  ;;  %v2762_v56 = vsel %vm2753_vm6, 0, %v159_v18  ;;  %v2764_v6 = vshrl.u32 %v393_v46, 5 }
  0x6f   : > { %v155_v1 = vmul.f32 %v154_v28, %v152_v51  ;;  %v398_v7 = vshll.u32 %v2503_v33, %v395_v17  ;;  %vm2769_vm8 = vcmp.le.f32.partialorder %v175_v8, 0.7853982  ;;  %v339_v11 = vadd.s32 536870912, %v338_v63 }
  0x70   : > { %v250_v9 = vor.u32 %v249_v59, %v248_v55  ;;  %v253_v10 = vshll.u32 %v252_v61, 23  ;;  %v399_v12 = vshrl.u32 %v2504_v35, %v396_v58  ;;  %v401_v15 = vshll.u32 %v2504_v35, %v395_v17 }
  0x71   : > { %v156_v2 = vxor.u32 2147483648, %v155_v1  ;;  %v402_v19 = vshrl.u32 %v2505_v37, %v396_v58  ;;  %v404_v30 = vshll.u32 %v2505_v37, %v395_v17  ;;  %v2779_v8 = vshrl.u32 %v339_v11, 30 }
  0x72   : > { %v254_v21 = vor.u32 4788187, %v253_v10  ;;  %v257_v22 = vcvt.s32.f32 %v250_v9  ;;  %v405_v23 = vshrl.u32 %v2506_v39, %v396_v58  ;;  %v261_v24 = vsub.s32 4, %v2703_v29 }
  0x73   : > { %v157_v13 = vsel %vm74_vm2, %v156_v2, %v155_v1  ;;  %v407_v25 = vshll.u32 %v2506_v39, %v395_v17  ;;  %v408_v14 = vshrl.u32 %v2507_v41, %v396_v58  ;;  %vm413_vm9 = vcmp.lt.s32.totalorder %v2764_v6, 1 }
  0x74   : > { %v160_v32 = vsel %vm2753_vm6, %v2579_v3, %v157_v13  ;;  %v255_v36 = vand.u32 2147483647, %v254_v21  ;;  %v341_v42 = vshll.u32 %v2779_v8, 30  ;;  %v400_v38 = vor.u32 %v399_v12, %v398_v7 }
  0x75   : > { %v403_v44 = vor.u32 %v402_v19, %v401_v15  ;;  %v409_v16 = vor.u32 %v408_v14, %v407_v25  ;;  %v410_v28 = vshll.u32 %v2507_v41, %v395_v17  ;;  %v411_v45 = vshrl.u32 %v2508_v49, %v396_v58 }
  0x76   : > { %v258_v46 = vmul.f32 %v257_v22, %v255_v36  ;;  %v2792_v47 = vsub.s32 %v338_v63, %v341_v42  ;;  %v397_v50 = vshrl.u32 %v2503_v33, %v396_v58  ;;  %v406_v51 = vor.u32 %v405_v23, %v404_v30 }
  0x77   : > { %2382 = vcosq.f32 %v160_v32  ;;  %v262_v52 = vsel %vm177_vm7, %v261_v24, %v2703_v29  ;;  %vm415_vm10 = vcmp.lt.s32.totalorder %v2764_v6, 3  ;;  %vm416_vm11 = vcmp.lt.s32.totalorder %v2764_v6, 4 }
  0x78   : > { %v259_v53 = vxor.u32 2147483648, %v258_v46  ;;  %v344_v17 = vsub.s32 0, %v2792_v47  ;;  %v412_v18 = vor.u32 %v411_v45, %v410_v28  ;;  %v418_v54 = vsel %vm416_vm11, %v406_v51, 2102212464 }
  0x79   : > { %vm414_vm12 = vcmp.lt.s32.totalorder %v2764_v6, 2  ;;  %v421_v55 = vsel %vm413_vm9, %v400_v38, %v403_v44  ;;  %v422_v57 = vsel %vm416_vm11, %v409_v16, 920167782  ;;  %v429_v29 = vshll.u32 %v389_v31, 8 }
  0x7a   : > { %2384 = vsinq.f32 %v160_v32  ;;  %v260_v60 = vsel %vm177_vm7, %v259_v53, %v258_v46  ;;  %vm280_vm13 = vcmp.lt.s32.totalorder %v2583_v5, 0  ;;  %v2250_v1 = vmin.u32 %v344_v17, %v2792_v47 }
  0x7b   : > { %v417_v34 = vsel %vm413_vm9, %v397_v50, %v400_v38  ;;  %v263_v58 = vsel %vm2769_vm8, %v2581_v4, %v260_v60  ;;  %v419_v59 = vsel %vm415_vm10, %v403_v44, %v418_v54  ;;  %v423_v61 = vsel %vm415_vm10, %v406_v51, %v422_v57 }
  0x7c   : > { %v425_v63 = vsel %vm413_vm9, %v403_v44, %v406_v51  ;;  %2386 = vcosq.f32 %v263_v58  ;;  %v346_v31 = vclz %v2250_v1  ;;  %v424_v2 = vsel %vm414_vm12, %v421_v55, %v423_v61 }
  0x7d   : > { %v426_v7 = vsel %vm416_vm11, %v412_v18, 1326507024  ;;  %2388 = vsinq.f32 %v263_v58  ;;  %v2829_v10 = vmul.u32.u64.low %v429_v29, %v424_v2  ;;  %v2830_v11 = vmul.u32.u64.high %v429_v29, %v424_v2, %v2829_v10 }
  0x7e   : > { %v427_v9 = vsel %vm415_vm10, %v409_v16, %v426_v7  ;;  %v2834_v12 = vand.u32 3, %v2762_v56  ;;  %v2251_v13 = vadd.s32 4294967294, %v346_v31  ;;  %v420_v15 = vsel %vm414_vm12, %v417_v34, %v419_v59 }
  0x7f   : > { %v428_v19 = vsel %vm414_vm12, %v425_v63, %v427_v9  ;;  %v264_v30 = vsel %vm2769_vm8, 0, %v262_v52  ;;  %v364_v21 = vsub.s32 4, %v2779_v8  ;;  %vm2848_vm14 = vcmp.le.f32.partialorder %v278_v27, 0.7853982 }
  0x80   : > { %v2843_v22 = vmul.u32.u64.low %v429_v29, %v428_v19  ;;  %v2844_v23 = vmul.u32.u64.high %v429_v29, %v428_v19, %v2843_v22  ;;  %v334_v25 = vadd.s32 %v2731_v40, %v2728_v26  ;;  %vm2252_vm15 = vcmp.lt.s32.totalorder %v2251_v13, 0 }
  0x81   : > { %v577_v6 = vadd.s32 3, %v2762_v56  ;;  %v2383_v14 = vpop.eup %2382  ;;  %v2855_v43 = vand.u32 3, %v264_v30  ;;  %v349_v32 = vsel %vm2252_vm15, 0, %v2251_v13  ;;  %v436_v36 = vmul.u32 %v429_v29, %v420_v15 }
  0x82   : > { %v439_v42 = vadd.s32 1, %v2830_v11  ;;  %v350_v38 = vsub.s32 32, %v349_v32  ;;  %v351_v44 = vshll.u32 %v2792_v47, %v349_v32  ;;  %v354_v27 = vsub.s32 4294967266, %v349_v32 }
  0x83   : > { %v681_v16 = vadd.s32 3, %v264_v30  ;;  %vm166_vm0 = vcmp.lt.s32.totalorder %v2834_v12, 2  ;;  %vm167_vm1 = vcmp.eq.s32.totalorder %v2834_v12, 0  ;;  %v365_v26 = vsel %vm280_vm13, %v364_v21, %v2779_v8 }
  0x84   : > { %vm438_vm2 = vc.u32 %v2844_v23, %v2829_v10  ;;  %v2385_v40 = vpop.eup %2384  ;;  %v352_v56 = vshrl.u32 %v334_v25, %v350_v38  ;;  %v355_v28 = vadd.s32 127, %v354_v27  ;;  %v578_v46 = vand.u32 3, %v577_v6 }
  0x85   : > { %v440_v45 = vsel %vm438_vm2, %v439_v42, %v2830_v11  ;;  %vm170_vm3 = vcmp.eq.s32.totalorder %v2834_v12, 2  ;;  %v171_v47 = vxor.u32 2147483648, %v2383_v14  ;;  %vm269_vm4 = vcmp.lt.s32.totalorder %v2855_v43, 2 }
  0x86   : > { %v441_v50 = vadd.s32 %v440_v45, %v436_v36  ;;  %v2387_v51 = vpop.eup %2386  ;;  %vm270_vm5 = vcmp.eq.s32.totalorder %v2855_v43, 0  ;;  %v353_v52 = vor.u32 %v352_v56, %v351_v44  ;;  %v356_v8 = vshll.u32 %v355_v28, 23 }
  0x87   : > { %v682_v53 = vand.u32 3, %v681_v16  ;;  %v2389_v17 = vpop.eup %2388  ;;  %v168_v18 = vxor.u32 2147483648, %v2385_v40  ;;  %vm273_vm6 = vcmp.eq.s32.totalorder %v2855_v43, 2  ;;  %v367_v54 = vsel %vm2848_vm14, 0, %v365_v26 }
  0x88   : > { %v442_v55 = vadd.s32 536870912, %v441_v50  ;;  %v274_v57 = vxor.u32 2147483648, %v2387_v51  ;;  %v357_v29 = vor.u32 4788187, %v356_v8  ;;  %v360_v60 = vcvt.s32.f32 %v353_v52 }
  0x89   : > { %vm580_vm7 = vcmp.eq.s32.totalorder %v578_v46, 0  ;;  %v172_v1 = vsel %vm170_vm3, %v171_v47, %v2385_v40  ;;  %v271_v34 = vxor.u32 2147483648, %v2389_v17  ;;  %vm583_vm8 = vcmp.eq.s32.totalorder %v578_v46, 2 }
  0x8a   : > { %v443_v58 = vshrl.u32 %v442_v55, 30  ;;  %v358_v59 = vand.u32 2147483647, %v357_v29  ;;  %vm684_vm9 = vcmp.eq.s32.totalorder %v682_v53, 0  ;;  %vm687_vm10 = vcmp.eq.s32.totalorder %v682_v53, 2 }
  0x8b   : > { %v785_v61 = vadd.s32 3, %v367_v54  ;;  %v169_v63 = vsel %vm167_vm1, %v2383_v14, %v168_v18  ;;  %vm579_vm11 = vcmp.lt.s32.totalorder %v578_v46, 2  ;;  %v582_v2 = vsel %vm580_vm7, %v2383_v14, %v168_v18 }
  0x8c   : > { %v444_v31 = vshll.u32 %v443_v58, 30  ;;  %v275_v7 = vsel %vm273_vm6, %v274_v57, %v2389_v17  ;;  %v361_v9 = vmul.f32 %v360_v60, %v358_v59  ;;  %v585_v11 = vsel %vm583_vm8, %v171_v47, %v2385_v40 }
  0x8d   : > { %vm683_vm12 = vcmp.lt.s32.totalorder %v682_v53, 2  ;;  %v272_v13 = vsel %vm270_vm5, %v2387_v51, %v271_v34  ;;  %v686_v19 = vsel %vm684_vm9, %v2387_v51, %v271_v34  ;;  %v689_v30 = vsel %vm687_vm10, %v274_v57, %v2389_v17 }
  0x8e   : > { %v2885_v15 = vsub.s32 %v441_v50, %v444_v31  ;;  %vm164_vm15 = vweird.f32 %v2579_v3  ;;  %v173_v21 = vsel %vm166_vm0, %v169_v63, %v172_v1  ;;  %v362_v22 = vxor.u32 2147483648, %v361_v9 }
  0x8f   : > { %vm267_vm1 = vweird.f32 %v2581_v4  ;;  %v586_v6 = vsel %vm579_vm11, %v582_v2, %v585_v11  ;;  %v276_v14 = vsel %vm269_vm4, %v272_v13, %v275_v7  ;;  %v2897_v36 = vand.u32 3, %v367_v54 }
  0x90   : > { %v447_v25 = vsub.s32 0, %v2885_v15  ;;  %v363_v32 = vsel %vm280_vm13, %v362_v22, %v361_v9  ;;  %v690_v42 = vsel %vm683_vm12, %v686_v19, %v689_v30  ;;  %v2901_v12 = vsel %vm164_vm15, nan, %v173_v21 }
  0x91   : > { %v366_v38 = vsel %vm2848_vm14, %v2583_v5, %v363_v32  ;;  %vm2908_vm0 = vcmp.le.f32.partialorder %v381_v20, 0.7853982  ;;  %v2913_v27 = vand.u32 3, %v785_v61  ;;  %v467_v16 = vsub.s32 4, %v443_v58 }
  0x92   : > { %v2254_v44 = vmin.u32 %v447_v25, %v2885_v15  ;;  %2390 = vcosq.f32 %v366_v38  ;;  %v2917_v26 = vsel %vm164_vm15, nan, %v586_v6  ;;  %v2920_v40 = vstv %s2875_s16  ;;  %s2509_s16 = smov (%p54_p2), [#allocation9]  }
  0x93   : > { %v2926_v20 = vsel %vm267_vm1, nan, %v276_v14  ;;  %2392 = vsinq.f32 %v366_v38  ;;  %v2930_v56 = vsel %vm267_vm1, nan, %v690_v42  ;;  %vm376_vm13 = vcmp.eq.s32.totalorder %v2897_v36, 2 }
  0x94   : > { %v449_v24 = vclz %v2254_v44  ;;  %vm383_vm14 = vcmp.lt.s32.totalorder %v2674_v62, 0  ;;  %v2935_v3 = vstv %s2881_s17  ;;  %vm373_vm2 = vcmp.eq.s32.totalorder %v2897_v36, 0  ;;  %s2215_s17 = sshll.u32 (%p54_p2), %s2509_s16, 4  ;;  %s2216_s17 = int_to_ptr.vmem [resolvable:$true] %s2215_s17 }
  0x95   : > { %v437_v28 = vadd.s32 %v2829_v10, %v2844_v23  ;;  %v920_v4 = vmul.f32 %v2901_v12, %v2901_v12  ;;  %v924_v46 = vmul.f32 %v2917_v26, %v2917_v26  ;;  %vm372_vm3 = vcmp.lt.s32.totalorder %v2897_v36, 2  ;;  %p2465_p4 = scmp.lt.s32.totalorder (%p54_p2), %s2216_s17, %s2216_s17 }
  0x96   : > { %v2255_v45 = vadd.s32 4294967294, %v449_v24  ;;  %v468_v47 = vsel %vm383_vm14, %v467_v16, %v443_v58  ;;  %vm787_vm4 = vcmp.lt.s32.totalorder %v2913_v27, 2  ;;  %v902_v50 = vmul.f32 %v2920_v40, %v2901_v12 }
  0x97   : > { %v921_v10 = vmul.f32 %v2926_v20, %v2926_v20  ;;  %v925_v23 = vmul.f32 %v2930_v56, %v2930_v56  ;;  %vm370_vm5 = vweird.f32 %v2583_v5  ;;  %v903_v51 = vmul.f32 %v2920_v40, %v2926_v20 }
  0x98   : > { %vm2256_vm6 = vcmp.lt.s32.totalorder %v2255_v45, 0  ;;  %v912_v52 = vmul.f32 %v2935_v3, %v2917_v26  ;;  %v913_v8 = vmul.f32 %v2935_v3, %v2930_v56  ;;  %vm788_vm7 = vcmp.eq.s32.totalorder %v2913_v27, 0 }
  0x99   : > { %v452_v53 = vsel %vm2256_vm6, 0, %v2255_v45  ;;  %v932_v17 = vmul.f32 %v2917_v26, %v2901_v12  ;;  %v933_v18 = vmul.f32 %v2930_v56, %v2926_v20  ;;  %v928_v29 = vsub.f32 %v920_v4, %v924_v46 }
  0x9a   : > { %v453_v54 = vsub.s32 32, %v452_v53  ;;  %v454_v55 = vshll.u32 %v2885_v15, %v452_v53  ;;  %v457_v57 = vsub.s32 4294967266, %v452_v53  ;;  %v2973_v60 = vsel %vm2908_vm0, 0, %v468_v47 }
  0x9b   : > { %vm791_vm8 = vcmp.eq.s32.totalorder %v2913_v27, 2  ;;  %v929_v1 = vsub.f32 %v921_v10, %v925_v23  ;;  %v2977_v34 = vstv %s2922_s18  ;;  %v916_v61 = vadd.f32 %v912_v52, %v902_v50  ;;  %s2460_s18 = scalar_lea.vmem (%p54_p2), %s2216_s17, 4096 }
  0x9c   : > { %v455_v58 = vshrl.u32 %v437_v28, %v453_v54  ;;  %v458_v59 = vadd.s32 127, %v457_v57  ;;  %v917_v63 = vadd.f32 %v913_v8, %v903_v51  ;;  %v2391_v31 = vpop.eup %2390  ;;  %v936_v2 = vadd.f32 %v932_v17, %v932_v17  ;;  %p2461_p3 = scmp.ne.s32.totalorder (%p54_p2), %s2216_s17, %s2460_s18  ;;  %p2466_p5 = scmp.lt.s32.totalorder (%p54_p2), %s2460_s18, %s2460_s18 }
  0x9d   : > { %v937_v7 = vadd.f32 %v933_v18, %v933_v18  ;;  %v2980_v9 = vstv %s2937_s19  ;;  %v2983_v11 = vstv %s2939_s20  ;;  %v2393_v13 = vpop.eup %2392  ;;  %v377_v15 = vxor.u32 2147483648, %v2391_v31 }
  0x9e   : > { %v456_v19 = vor.u32 %v455_v58, %v454_v55  ;;  %v459_v30 = vshll.u32 %v458_v59, 23  ;;  %v942_v21 = vmul.f32 %v2977_v34, %v928_v29  ;;  %v374_v22 = vxor.u32 2147483648, %v2393_v13  ;;  %p2467_p6 = por (%p54_p2), %p2466_p5, %p2465_p4 }
  0x9f   : > { %v943_v25 = vmul.f32 %v2977_v34, %v929_v1  ;;  %v960_v6 = vmul.f32 %v928_v29, %v2901_v12  ;;  %v961_v14 = vmul.f32 %v929_v1, %v2926_v20  ;;  %v378_v32 = vsel %vm376_vm13, %v377_v15, %v2393_v13 }
  0xa0   : > { %v460_v42 = vor.u32 4788187, %v459_v30  ;;  %v463_v38 = vcvt.s32.f32 %v456_v19  ;;  %v793_v44 = vsel %vm791_vm8, %v377_v15, %v2393_v13  ;;  %v375_v16 = vsel %vm373_vm2, %v2391_v31, %v374_v22  ;;  %p2468_p7 = pnand (%p54_p2), %p2467_p6, %p2461_p3 }
  0xa1   : > { %v790_v24 = vsel %vm788_vm7, %v2391_v31, %v374_v22  ;;  %v964_v28 = vmul.f32 %v936_v2, %v2917_v26  ;;  %v965_v45 = vmul.f32 %v937_v7, %v2930_v56  ;;  %v379_v4 = vsel %vm372_vm3, %v375_v16, %v378_v32 }
  0xa2   : > { %v461_v46 = vand.u32 2147483647, %v460_v42  ;;  %v794_v47 = vsel %vm787_vm4, %v790_v24, %v793_v44  ;;  %v976_v50 = vmul.f32 %v928_v29, %v2917_v26  ;;  %v3008_v10 = vsel %vm370_vm5, nan, %v379_v4 }
  0xa3   : > { %v3012_v23 = vsel %vm370_vm5, nan, %v794_v47  ;;  %v946_v51 = vadd.f32 %v942_v21, %v916_v61  ;;  %v952_v36 = vmul.f32 %v2980_v9, %v936_v2  ;;  %v922_v27 = vmul.f32 %v3008_v10, %v3008_v10 }
  0xa4   : > { %v464_v52 = vmul.f32 %v463_v38, %v461_v46  ;;  %v947_v8 = vadd.f32 %v943_v25, %v917_v63  ;;  %v953_v53 = vmul.f32 %v2980_v9, %v937_v7  ;;  %v926_v17 = vmul.f32 %v3012_v23, %v3012_v23 }
  0xa5   : > { %v934_v18 = vmul.f32 %v3012_v23, %v3008_v10  ;;  %v3022_v54 = vsub.f32 %v960_v6, %v964_v28  ;;  %v3024_v5 = vsub.f32 %v961_v14, %v965_v45  ;;  %v904_v57 = vmul.f32 %v2920_v40, %v3008_v10 }
  0xa6   : > { %v465_v55 = vxor.u32 2147483648, %v464_v52  ;;  %v914_v29 = vmul.f32 %v2935_v3, %v3012_v23  ;;  %v972_v58 = vmul.f32 %v936_v2, %v2901_v12  ;;  %v889_v59 = vadd.s32 3, %v2973_v60 }
  0xa7   : > { %v930_v61 = vsub.f32 %v922_v27, %v926_v17  ;;  %v938_v63 = vadd.f32 %v934_v18, %v934_v18  ;;  %v956_v13 = vadd.f32 %v952_v36, %v946_v51  ;;  %v973_v15 = vmul.f32 %v937_v7, %v2926_v20 }
  0xa8   : > { %v466_v31 = vsel %vm383_vm14, %v465_v55, %v464_v52  ;;  %v977_v19 = vmul.f32 %v929_v1, %v2930_v56  ;;  %v957_v21 = vadd.f32 %v953_v53, %v947_v8  ;;  %v986_v2 = vmul.f32 %v2983_v11, %v3022_v54 }
  0xa9   : > { %v469_v30 = vsel %vm2908_vm0, %v2674_v62, %v466_v31  ;;  %v987_v22 = vmul.f32 %v2983_v11, %v3024_v5  ;;  %v918_v25 = vadd.f32 %v914_v29, %v904_v57  ;;  %v980_v6 = vadd.f32 %v976_v50, %v972_v58 }
  0xaa   : > { %2394 = vcosq.f32 %v469_v30  ;;  %v3044_v14 = vstv %s3004_s21  ;;  %v944_v7 = vmul.f32 %v2977_v34, %v930_v61  ;;  %v962_v1 = vmul.f32 %v930_v61, %v3008_v10 }
  0xab   : > { %2396 = vsinq.f32 %v469_v30  ;;  %v966_v43 = vmul.f32 %v938_v63, %v3012_v23  ;;  %v474_v32 = vand.u32 3, %v2973_v60  ;;  %v974_v42 = vmul.f32 %v938_v63, %v3008_v10 }
  0xac   : > { %v978_v38 = vmul.f32 %v930_v61, %v3012_v23  ;;  %v981_v44 = vadd.f32 %v977_v19, %v973_v15  ;;  %v890_v16 = vand.u32 3, %v889_v59  ;;  %v990_v24 = vadd.f32 %v986_v2, %v956_v13 }
  0xad   : > { %v991_v28 = vadd.f32 %v987_v22, %v957_v21  ;;  %v3053_v45 = vmul.f32 0.8975979, %v2574_v0  ;;  %v996_v4 = vmul.f32 %v3044_v14, %v980_v6  ;;  %v1004_v47 = vmul.f32 %v3022_v54, %v2901_v12 }
  0xae   : > { %v997_v46 = vmul.f32 %v3044_v14, %v981_v44  ;;  %v1008_v60 = vmul.f32 %v980_v6, %v2917_v26  ;;  %vm473_vm9 = vweird.f32 %v2674_v62  ;;  %v948_v50 = vadd.f32 %v944_v7, %v918_v25 }
  0xaf   : > { %v954_v51 = vmul.f32 %v2980_v9, %v938_v63  ;;  %v970_v36 = vsub.f32 %v962_v1, %v966_v43  ;;  %vm475_vm10 = vcmp.lt.s32.totalorder %v474_v32, 2  ;;  %v982_v52 = vadd.f32 %v978_v38, %v974_v42 }
  0xb0   : > { %v1005_v0 = vmul.f32 %v3024_v5, %v2926_v20  ;;  %v1009_v27 = vmul.f32 %v981_v44, %v2930_v56  ;;  %vm476_vm11 = vcmp.eq.s32.totalorder %v474_v32, 0  ;;  %vm479_vm12 = vcmp.eq.s32.totalorder %v474_v32, 2 }
  0xb1   : > { %vm891_vm15 = vcmp.lt.s32.totalorder %v890_v16, 2  ;;  %vm892_vm1 = vcmp.eq.s32.totalorder %v890_v16, 0  ;;  %vm895_vm0 = vcmp.eq.s32.totalorder %v890_v16, 2  ;;  %v1000_v8 = vadd.f32 %v996_v4, %v990_v24 }
  0xb2   : > { %v1001_v53 = vadd.f32 %v997_v46, %v991_v28  ;;  %v1012_v17 = vsub.f32 %v1004_v47, %v1008_v60  ;;  %v958_v18 = vadd.f32 %v954_v51, %v948_v50  ;;  %v988_v55 = vmul.f32 %v2983_v11, %v970_v36  ;;  %v2414_v28 = vld [vmem:[%s2571_s15 + $0x8] sm:$0xff] }
  0xb3   : > { %v1016_v57 = vmul.f32 %v980_v6, %v2901_v12  ;;  %v1017_v29 = vmul.f32 %v981_v44, %v2926_v20  ;;  %v1006_v59 = vmul.f32 %v970_v36, %v3008_v10  ;;  %v1010_v61 = vmul.f32 %v982_v52, %v3012_v23 }
  0xb4   : > { %v2395_v58 = vpop.eup %2394  ;;  %v1013_v63 = vsub.f32 %v1005_v0, %v1009_v27  ;;  %v1020_v31 = vmul.f32 %v3022_v54, %v2917_v26  ;;  %v1021_v19 = vmul.f32 %v3024_v5, %v2930_v56  ;;  %v1052_v12 = vand.u32 2147483647, %v3053_v45 }
  0xb5   : > { %v2397_v13 = vpop.eup %2396  ;;  %v480_v15 = vxor.u32 2147483648, %v2395_v58  ;;  %v1055_v20 = vand.u32 2139095040, %v3053_v45  ;;  %v998_v21 = vmul.f32 %v3044_v14, %v982_v52  ;;  %v1018_v2 = vmul.f32 %v982_v52, %v3008_v10 }
  0xb6   : > { %v477_v30 = vxor.u32 2147483648, %v2397_v13  ;;  %v1022_v22 = vmul.f32 %v970_v36, %v3012_v23  ;;  %v992_v25 = vadd.f32 %v988_v55, %v958_v18  ;;  %v1014_v7 = vsub.f32 %v1006_v59, %v1010_v61 }
  0xb7   : > { %v481_v26 = vsel %vm479_vm12, %v480_v15, %v2397_v13  ;;  %v897_v54 = vsel %vm895_vm0, %v480_v15, %v2397_v13  ;;  %v1056_v6 = vshrl.u32 %v1055_v20, 23  ;;  %v3088_v1 = vstv %s3065_s22  ;;  %v2415_v15 = vld [vmem:[%s2571_s15 + $0x10] sm:$0xff]  ;;  %s2205_s15 = scalar_lea.vmem [#allocation9], %s2328_s2 }
  0xb8   : > { %v478_v56 = vsel %vm476_vm11, %v2395_v58, %v477_v30  ;;  %v894_v5 = vsel %vm892_vm1, %v2395_v58, %v477_v30  ;;  %v1059_v42 = vand.u32 8388607, %v1052_v12  ;;  %v1024_v24 = vadd.f32 %v1020_v31, %v1016_v57 }
  0xb9   : > { %v482_v43 = vsel %vm475_vm10, %v478_v56, %v481_v26  ;;  %v898_v10 = vsel %vm891_vm15, %v894_v5, %v897_v54  ;;  %v2279_v23 = vadd.s32 4294967169, %v1056_v6  ;;  %v3103_v4 = vmul.f32 0.8975979, %v2414_v28 }
  0xba   : > { %v3096_v38 = vsel %vm473_vm9, nan, %v482_v43  ;;  %v3100_v44 = vsel %vm473_vm9, nan, %v898_v10  ;;  %v1025_v32 = vadd.f32 %v1021_v19, %v1017_v29  ;;  %v1030_v16 = vmul.f32 %v3088_v1, %v1012_v17 }
  0xbb   : > { %v1031_v46 = vmul.f32 %v3088_v1, %v1013_v63  ;;  %v3108_v47 = vstv %s3070_s23  ;;  %v923_v60 = vmul.f32 %v3096_v38, %v3096_v38  ;;  %v927_v50 = vmul.f32 %v3100_v44, %v3100_v44 }
  0xbc   : > { %v1062_v62 = vadd.s32 1, %v2279_v23  ;;  %v1155_v51 = vand.u32 2147483647, %v3103_v4  ;;  %v1002_v36 = vadd.f32 %v998_v21, %v992_v25  ;;  %v1026_v52 = vadd.f32 %v1022_v22, %v1018_v2 }
  0xbd   : > { %v1032_v0 = vmul.f32 %v3088_v1, %v1014_v7  ;;  %v1060_v27 = vor.u32 8388608, %v1059_v42  ;;  %v905_v17 = vmul.f32 %v2920_v40, %v3096_v38  ;;  %v915_v18 = vmul.f32 %v2935_v3, %v3100_v44 }
  0xbe   : > { %v935_v55 = vmul.f32 %v3100_v44, %v3096_v38  ;;  %vm1063_vm13 = vcmp.gt.s32.totalorder %v1062_v62, 0  ;;  %v3123_v57 = vmul.f32 %v3108_v47, %v1024_v24  ;;  %v3126_v29 = vmul.f32 %v3108_v47, %v1025_v32 }
  0xbf   : > { %v1064_v58 = vsel %vm1063_vm13, %v1062_v62, 0  ;;  %v1158_v59 = vand.u32 2139095040, %v3103_v4  ;;  %v931_v61 = vsub.f32 %v923_v60, %v927_v50  ;;  %v3129_v63 = vadd.f32 %v1030_v16, %v1000_v8 }
  0xc0   : > { %v3131_v40 = vadd.f32 %v1031_v46, %v1001_v53  ;;  %v1162_v3 = vand.u32 8388607, %v1155_v51  ;;  %v3135_v31 = vadd.f32 %v1032_v0, %v1002_v36  ;;  %v3138_v13 = vmul.f32 %v3108_v47, %v1026_v52 }
  0xc1   : > { %v3141_v19 = vmul.f32 0.8975979, %v2415_v15  ;;  %v1066_v20 = vand.u32 31, %v1064_v58  ;;  %v919_v30 = vadd.f32 %v915_v18, %v905_v17  ;;  %v939_v21 = vadd.f32 %v935_v55, %v935_v55 }
  0xc2   : > { %v3144_v2 = vmul.f32 0.8975979, %v2651_v48  ;;  %v3146_v8 = vshll.u32 %v1060_v27, 8  ;;  %v1159_v26 = vshrl.u32 %v1158_v59, 23  ;;  %v945_v25 = vmul.f32 %v2977_v34, %v931_v61 }
  0xc3   : > { %v1067_v53 = vsub.s32 32, %v1066_v20  ;;  %v1069_v22 = vshll.u32 %v2503_v33, %v1066_v20  ;;  %v1258_v54 = vand.u32 2147483647, %v3141_v19  ;;  %v1065_v6 = vshrl.u32 %v1064_v58, 5 }
  0xc4   : > { %v1072_v56 = vshll.u32 %v2504_v35, %v1066_v20  ;;  %v1163_v5 = vor.u32 8388608, %v1162_v3  ;;  %v955_v7 = vmul.f32 %v2980_v9, %v939_v21  ;;  %v963_v43 = vmul.f32 %v931_v61, %v3096_v38 }
  0xc5   : > { %v979_v48 = vmul.f32 %v931_v61, %v3100_v44  ;;  %v1070_v10 = vshrl.u32 %v2504_v35, %v1067_v53  ;;  %v967_v23 = vmul.f32 %v939_v21, %v3100_v44  ;;  %v975_v42 = vmul.f32 %v939_v21, %v3096_v38 }
  0xc6   : > { %v1073_v24 = vshrl.u32 %v2505_v37, %v1067_v53  ;;  %v1075_v34 = vshll.u32 %v2505_v37, %v1066_v20  ;;  %v1068_v28 = vshrl.u32 %v2503_v33, %v1067_v53  ;;  %v1076_v16 = vshrl.u32 %v2506_v39, %v1067_v53 }
  0xc7   : > { %v1071_v32 = vor.u32 %v1070_v10, %v1069_v22  ;;  %v1078_v9 = vshll.u32 %v2506_v39, %v1066_v20  ;;  %v949_v46 = vadd.f32 %v945_v25, %v919_v30  ;;  %v1079_v50 = vshrl.u32 %v2507_v41, %v1067_v53 }
  0xc8   : > { %v1074_v60 = vor.u32 %v1073_v24, %v1072_v56  ;;  %vm1084_vm14 = vcmp.lt.s32.totalorder %v1065_v6, 1  ;;  %v1077_v62 = vor.u32 %v1076_v16, %v1075_v34  ;;  %v1081_v36 = vshll.u32 %v2507_v41, %v1066_v20 }
  0xc9   : > { %v1082_v52 = vshrl.u32 %v2508_v49, %v1067_v53  ;;  %v2283_v0 = vadd.s32 4294967169, %v1159_v26  ;;  %v1080_v27 = vor.u32 %v1079_v50, %v1078_v9  ;;  %vm1085_vm2 = vcmp.lt.s32.totalorder %v1065_v6, 2 }
  0xca   : > { %vm1086_vm3 = vcmp.lt.s32.totalorder %v1065_v6, 3  ;;  %vm1087_vm4 = vcmp.lt.s32.totalorder %v1065_v6, 4  ;;  %v1088_v18 = vsel %vm1084_vm14, %v1068_v28, %v1071_v32  ;;  %v1092_v58 = vsel %vm1084_vm14, %v1071_v32, %v1074_v60 }
  0xcb   : > { %v1083_v17 = vor.u32 %v1082_v52, %v1081_v36  ;;  %v1089_v55 = vsel %vm1087_vm4, %v1077_v62, 2102212464  ;;  %v1093_v61 = vsel %vm1087_vm4, %v1080_v27, 920167782  ;;  %v1096_v3 = vsel %vm1084_vm14, %v1074_v60, %v1077_v62 }
  0xcc   : > { %v1090_v59 = vsel %vm1086_vm3, %v1074_v60, %v1089_v55  ;;  %v3167_v15 = vshll.u32 %v1163_v5, 8  ;;  %v971_v30 = vsub.f32 %v963_v43, %v967_v23  ;;  %v1094_v20 = vsel %vm1086_vm3, %v1077_v62, %v1093_v61 }
  0xcd   : > { %v1097_v21 = vsel %vm1087_vm4, %v1083_v17, 1326507024  ;;  %v1165_v53 = vadd.s32 1, %v2283_v0  ;;  %v983_v22 = vadd.f32 %v979_v48, %v975_v42  ;;  %v1091_v26 = vsel %vm1085_vm2, %v1088_v18, %v1090_v59 }
  0xce   : > { %v1095_v25 = vsel %vm1085_vm2, %v1092_v58, %v1094_v20  ;;  %v1098_v56 = vsel %vm1086_vm3, %v1080_v27, %v1097_v21  ;;  %v959_v5 = vadd.f32 %v955_v7, %v949_v46  ;;  %v989_v42 = vmul.f32 %v2983_v11, %v971_v30 }
  0xcf   : > { %v1099_v10 = vsel %vm1085_vm2, %v1096_v3, %v1098_v56  ;;  %v3175_v24 = vmul.u32.u64.low %v3146_v8, %v1095_v25  ;;  %v3176_v34 = vmul.u32.u64.high %v3146_v8, %v1095_v25, %v3175_v24  ;;  %vm1166_vm5 = vcmp.gt.s32.totalorder %v1165_v53, 0 }
  0xd0   : > { %v3180_v43 = vmul.u32.u64.low %v3146_v8, %v1099_v10  ;;  %v3181_v23 = vmul.u32.u64.high %v3146_v8, %v1099_v10, %v3180_v43  ;;  %v1167_v48 = vsel %vm1166_vm5, %v1165_v53, 0  ;;  %v3185_v28 = vmul.f32 %v3044_v14, %v983_v22 }
  0xd1   : > { %v3188_v6 = vmul.f32 %v971_v30, %v3096_v38  ;;  %v1169_v32 = vand.u32 31, %v1167_v48  ;;  %v3191_v16 = vmul.f32 %v983_v22, %v3100_v44  ;;  %v1019_v9 = vmul.f32 %v983_v22, %v3096_v38 }
  0xd2   : > { %v1107_v7 = vmul.u32 %v3146_v8, %v1091_v26  ;;  %v1168_v46 = vshrl.u32 %v1167_v48, 5  ;;  %v1110_v60 = vadd.s32 1, %v3176_v34  ;;  %vm1109_vm6 = vc.u32 %v3181_v23, %v3175_v24 }
  0xd3   : > { %v1170_v50 = vsub.s32 32, %v1169_v32  ;;  %v1172_v11 = vshll.u32 %v2503_v33, %v1169_v32  ;;  %v1175_v14 = vshll.u32 %v2504_v35, %v1169_v32  ;;  %v1178_v62 = vshll.u32 %v2505_v37, %v1169_v32 }
  0xd4   : > { %v1181_v36 = vshll.u32 %v2506_v39, %v1169_v32  ;;  %v1261_v52 = vand.u32 2139095040, %v3141_v19  ;;  %v1111_v38 = vsel %vm1109_vm6, %v1110_v60, %v3176_v34  ;;  %v1184_v58 = vshll.u32 %v2507_v41, %v1169_v32 }
  0xd5   : > { %v1171_v8 = vshrl.u32 %v2503_v33, %v1170_v50  ;;  %v1173_v0 = vshrl.u32 %v2504_v35, %v1170_v50  ;;  %v1176_v27 = vshrl.u32 %v2505_v37, %v1170_v50  ;;  %v1112_v17 = vadd.s32 %v1111_v38, %v1107_v7 }
  0xd6   : > { %v1179_v18 = vshrl.u32 %v2506_v39, %v1170_v50  ;;  %v1182_v55 = vshrl.u32 %v2507_v41, %v1170_v50  ;;  %v1185_v3 = vshrl.u32 %v2508_v49, %v1170_v50  ;;  %vm1187_vm7 = vcmp.lt.s32.totalorder %v1168_v46, 1 }
  0xd7   : > { %v1174_v59 = vor.u32 %v1173_v0, %v1172_v11  ;;  %v1177_v61 = vor.u32 %v1176_v27, %v1175_v14  ;;  %v1113_v20 = vadd.s32 536870912, %v1112_v17  ;;  %vm1188_vm8 = vcmp.lt.s32.totalorder %v1168_v46, 2 }
  0xd8   : > { %v1180_v21 = vor.u32 %v1179_v18, %v1178_v62  ;;  %v1183_v53 = vor.u32 %v1182_v55, %v1181_v36  ;;  %v1186_v22 = vor.u32 %v1185_v3, %v1184_v58  ;;  %vm1189_vm9 = vcmp.lt.s32.totalorder %v1168_v46, 3 }
  0xd9   : > { %vm1190_vm10 = vcmp.lt.s32.totalorder %v1168_v46, 4  ;;  %v1191_v26 = vsel %vm1187_vm7, %v1171_v8, %v1174_v59  ;;  %v1114_v25 = vshrl.u32 %v1113_v20, 30  ;;  %v1195_v10 = vsel %vm1187_vm7, %v1174_v59, %v1177_v61 }
  0xda   : > { %v1192_v56 = vsel %vm1190_vm10, %v1180_v21, 2102212464  ;;  %v1196_v34 = vsel %vm1190_vm10, %v1183_v53, 920167782  ;;  %vm1054_vm11 = vcmp.lt.s32.totalorder %v3053_v45, 0  ;;  %v1199_v32 = vsel %vm1187_vm7, %v1177_v61, %v1180_v21 }
  0xdb   : > { %v1193_v43 = vsel %vm1189_vm9, %v1177_v61, %v1192_v56  ;;  %v1197_v48 = vsel %vm1189_vm9, %v1180_v21, %v1196_v34  ;;  %v1200_v7 = vsel %vm1190_vm10, %v1186_v22, 1326507024  ;;  %v993_v60 = vadd.f32 %v989_v42, %v959_v5 }
  0xdc   : > { %v1023_v50 = vmul.f32 %v971_v30, %v3100_v44  ;;  %v1115_v11 = vshll.u32 %v1114_v25, 30  ;;  %v1198_v14 = vsel %vm1188_vm8, %v1195_v10, %v1197_v48  ;;  %v1015_v62 = vsub.f32 %v3188_v6, %v3191_v16 }
  0xdd   : > { %v1201_v36 = vsel %vm1189_vm9, %v1183_v53, %v1200_v7  ;;  %v3223_v38 = vmul.u32.u64.low %v3167_v15, %v1198_v14  ;;  %v3224_v8 = vmul.u32.u64.high %v3167_v15, %v1198_v14, %v3223_v38  ;;  %v1194_v27 = vsel %vm1188_vm8, %v1191_v26, %v1193_v43 }
  0xde   : > { %v3226_v0 = vsub.s32 %v1112_v17, %v1115_v11  ;;  %v1202_v5 = vsel %vm1188_vm8, %v1199_v32, %v1201_v36  ;;  %v1262_v42 = vshrl.u32 %v1261_v52, 23  ;;  %v3232_v44 = vadd.f32 %v3123_v57, %v3129_v63 }
  0xdf   : > { %v3235_v30 = vmul.u32.u64.low %v3167_v15, %v1202_v5  ;;  %v3236_v6 = vmul.u32.u64.high %v3167_v15, %v1202_v5, %v3235_v30  ;;  %v1364_v16 = vand.u32 2139095040, %v3144_v2  ;;  %v1138_v55 = vsub.s32 4, %v1114_v25 }
  0xe0   : > { %v1118_v18 = vsub.s32 0, %v3226_v0  ;;  %v2287_v17 = vadd.s32 4294967169, %v1262_v42  ;;  %v1265_v58 = vand.u32 8388607, %v1258_v54  ;;  %v1027_v46 = vadd.f32 %v1023_v50, %v1019_v9 }
  0xe1   : > { %v3244_v52 = vadd.f32 %v3126_v29, %v3131_v40  ;;  %v1210_v57 = vmul.u32 %v3167_v15, %v1194_v27  ;;  %v1213_v63 = vadd.s32 1, %v3224_v8  ;;  %v1003_v59 = vadd.f32 %v3185_v28, %v993_v60 }
  0xe2   : > { %v1033_v61 = vmul.f32 %v3088_v1, %v1015_v62  ;;  %v2280_v3 = vmin.u32 %v1118_v18, %v3226_v0  ;;  %v1361_v20 = vand.u32 2147483647, %v3144_v2  ;;  %v3254_v21 = vadd.f32 %v3138_v13, %v3135_v31 }
  0xe3   : > { %vm1212_vm12 = vc.u32 %v3236_v6, %v3223_v38  ;;  %v1268_v29 = vadd.s32 1, %v2287_v17  ;;  %v1365_v40 = vshrl.u32 %v1364_v16, 23  ;;  %v1139_v15 = vsel %vm1054_vm11, %v1138_v55, %v1114_v25 }
  0xe4   : > { %v1120_v9 = vclz %v2280_v3  ;;  %v1214_v28 = vsel %vm1212_vm12, %v1213_v63, %v3224_v8  ;;  %v1266_v53 = vor.u32 8388608, %v1265_v58  ;;  %v3261_v1 = vmul.f32 %v3108_v47, %v1027_v46 }
  0xe5   : > { %vm3265_vm15 = vcmp.le.f32.partialorder %v1052_v12, 0.7853982  ;;  %v1215_v31 = vadd.s32 %v1214_v28, %v1210_v57  ;;  %vm1269_vm1 = vcmp.gt.s32.totalorder %v1268_v29, 0  ;;  %v3269_v13 = vadd.f32 %v1033_v61, %v1003_v59 }
  0xe6   : > { %v2281_v26 = vadd.s32 4294967294, %v1120_v9  ;;  %v1270_v56 = vsel %vm1269_vm1, %v1268_v29, 0  ;;  %v1368_v25 = vand.u32 8388607, %v1361_v20  ;;  %v1141_v10 = vsel %vm3265_vm15, 0, %v1139_v15 }
  0xe7   : > { %v1216_v47 = vadd.s32 536870912, %v1215_v31  ;;  %v1272_v34 = vand.u32 31, %v1270_v56  ;;  %v2291_v43 = vadd.s32 4294967169, %v1365_v40  ;;  %v1108_v12 = vadd.s32 %v3175_v24, %v3181_v23 }
  0xe8   : > { %vm2282_vm0 = vcmp.lt.s32.totalorder %v2281_v26, 0  ;;  %v3277_v48 = vand.u32 3, %v1141_v10  ;;  %v3279_v32 = vshll.u32 %v1266_v53, 8  ;;  %v3282_v60 = vadd.s32 %v3223_v38, %v3236_v6 }
  0xe9   : > { %v1123_v7 = vsel %vm2282_vm0, 0, %v2281_v26  ;;  %v3284_v50 = vshrl.u32 %v1216_v47, 30  ;;  %v1273_v11 = vsub.s32 32, %v1272_v34  ;;  %v1369_v8 = vor.u32 8388608, %v1368_v25 }
  0xea   : > { %v1124_v14 = vsub.s32 32, %v1123_v7  ;;  %v1125_v62 = vshll.u32 %v3226_v0, %v1123_v7  ;;  %v1128_v36 = vsub.s32 4294967266, %v1123_v7  ;;  %v1275_v24 = vshll.u32 %v2503_v33, %v1272_v34 }
  0xeb   : > { %v1218_v27 = vshll.u32 %v3284_v50, 30  ;;  %v1371_v23 = vadd.s32 1, %v2291_v43  ;;  %v1557_v5 = vadd.s32 3, %v1141_v10  ;;  %v1276_v16 = vshrl.u32 %v2504_v35, %v1273_v11 }
  0xec   : > { %v1126_v42 = vshrl.u32 %v1108_v12, %v1124_v14  ;;  %v1129_v30 = vadd.s32 127, %v1128_v36  ;;  %v1278_v38 = vshll.u32 %v2504_v35, %v1272_v34  ;;  %v1279_v18 = vshrl.u32 %v2505_v37, %v1273_v11 }
  0xed   : > { %v3291_v6 = vsub.s32 %v1215_v31, %v1218_v27  ;;  %v1281_v0 = vshll.u32 %v2505_v37, %v1272_v34  ;;  %v1282_v55 = vshrl.u32 %v2506_v39, %v1273_v11  ;;  %v1271_v46 = vshrl.u32 %v1270_v56, 5 }
  0xee   : > { %v1127_v17 = vor.u32 %v1126_v42, %v1125_v62  ;;  %v1130_v58 = vshll.u32 %v1129_v30, 23  ;;  %v3296_v57 = vshll.u32 %v1369_v8, 8  ;;  %v1274_v59 = vshrl.u32 %v2503_v33, %v1273_v11 }
  0xef   : > { %v1221_v63 = vsub.s32 0, %v3291_v6  ;;  %v1284_v61 = vshll.u32 %v2506_v39, %v1272_v34  ;;  %vm1372_vm13 = vcmp.gt.s32.totalorder %v1371_v23, 0  ;;  %v1285_v40 = vshrl.u32 %v2507_v41, %v1273_v11 }
  0xf0   : > { %v1131_v3 = vor.u32 4788187, %v1130_v58  ;;  %v1134_v29 = vcvt.s32.f32 %v1127_v17  ;;  %v1287_v9 = vshll.u32 %v2507_v41, %v1272_v34  ;;  %v1277_v28 = vor.u32 %v1276_v16, %v1275_v24 }
  0xf1   : > { %v2284_v15 = vmin.u32 %v1221_v63, %v3291_v6  ;;  %v1280_v53 = vor.u32 %v1279_v18, %v1278_v38  ;;  %v1283_v31 = vor.u32 %v1282_v55, %v1281_v0  ;;  %v1286_v56 = vor.u32 %v1285_v40, %v1284_v61 }
  0xf2   : > { %v1132_v26 = vand.u32 2147483647, %v1131_v3  ;;  %v1288_v25 = vshrl.u32 %v2508_v49, %v1273_v11  ;;  %vm1290_vm14 = vcmp.lt.s32.totalorder %v1271_v46, 1  ;;  %vm1291_vm2 = vcmp.lt.s32.totalorder %v1271_v46, 2 }
  0xf3   : > { %v1223_v10 = vclz %v2284_v15  ;;  %vm1292_vm3 = vcmp.lt.s32.totalorder %v1271_v46, 3  ;;  %vm1293_vm4 = vcmp.lt.s32.totalorder %v1271_v46, 4  ;;  %v1294_v12 = vsel %vm1290_vm14, %v1274_v59, %v1277_v28 }
  0xf4   : > { %v1135_v47 = vmul.f32 %v1134_v29, %v1132_v26  ;;  %v1289_v43 = vor.u32 %v1288_v25, %v1287_v9  ;;  %v1295_v34 = vsel %vm1293_vm4, %v1283_v31, 2102212464  ;;  %v1298_v62 = vsel %vm1290_vm14, %v1277_v28, %v1280_v53 }
  0xf5   : > { %v2285_v7 = vadd.s32 4294967294, %v1223_v10  ;;  %v1296_v14 = vsel %vm1292_vm3, %v1280_v53, %v1295_v34  ;;  %v1299_v36 = vsel %vm1293_vm4, %v1286_v56, 920167782  ;;  %v1373_v27 = vsel %vm1372_vm13, %v1371_v23, 0 }
  0xf6   : > { %v1136_v8 = vxor.u32 2147483648, %v1135_v47  ;;  %v1300_v11 = vsel %vm1292_vm3, %v1283_v31, %v1299_v36  ;;  %v3312_v24 = vand.u32 3, %v1557_v5  ;;  %vm1157_vm5 = vcmp.lt.s32.totalorder %v3103_v4, 0 }
  0xf7   : > { %vm2286_vm6 = vcmp.lt.s32.totalorder %v2285_v7, 0  ;;  %v1301_v42 = vsel %vm1291_vm2, %v1298_v62, %v1300_v11  ;;  %v1302_v30 = vsel %vm1290_vm14, %v1280_v53, %v1283_v31  ;;  %v1303_v16 = vsel %vm1293_vm4, %v1289_v43, 1326507024 }
  0xf8   : > { %v1137_v38 = vsel %vm1054_vm11, %v1136_v8, %v1135_v47  ;;  %v1226_v18 = vsel %vm2286_vm6, 0, %v2285_v7  ;;  %v1297_v0 = vsel %vm1291_vm2, %v1294_v12, %v1296_v14  ;;  %v1304_v55 = vsel %vm1292_vm3, %v1286_v56, %v1303_v16 }
  0xf9   : > { %v1140_v23 = vsel %vm3265_vm15, %v3053_v45, %v1137_v38  ;;  %v1227_v5 = vsub.s32 32, %v1226_v18  ;;  %v1228_v17 = vshll.u32 %v3291_v6, %v1226_v18  ;;  %v1231_v58 = vsub.s32 4294967266, %v1226_v18 }
  0xfa   : > { %2398 = vcosq.f32 %v1140_v23  ;;  %v1305_v63 = vsel %vm1291_vm2, %v1302_v30, %v1304_v55  ;;  %v3328_v59 = vmul.u32.u64.low %v3279_v32, %v1301_v42  ;;  %v3329_v61 = vmul.u32.u64.high %v3279_v32, %v1301_v42, %v3328_v59 }
  0xfb   : > { %2400 = vsinq.f32 %v1140_v23  ;;  %v1229_v3 = vshrl.u32 %v3282_v60, %v1227_v5  ;;  %v1232_v29 = vadd.s32 127, %v1231_v58  ;;  %v1375_v40 = vand.u32 31, %v1373_v27 }
  0xfc   : > { %vm1150_vm7 = vcmp.eq.s32.totalorder %v3277_v48, 2  ;;  %v1241_v22 = vsub.s32 4, %v3284_v50  ;;  %v3336_v6 = vmul.u32.u64.low %v3279_v32, %v1305_v63  ;;  %v3337_v9 = vmul.u32.u64.high %v3279_v32, %v1305_v63, %v3336_v6 }
  0xfd   : > { %v1313_v46 = vmul.u32 %v3279_v32, %v1297_v0  ;;  %vm1147_vm8 = vcmp.eq.s32.totalorder %v3277_v48, 0  ;;  %vm3343_vm9 = vcmp.le.f32.partialorder %v1155_v51, 0.7853982  ;;  %v1230_v60 = vor.u32 %v1229_v3, %v1228_v17 }
  0xfe   : > { %v1233_v28 = vshll.u32 %v1232_v29, 23  ;;  %v1376_v53 = vsub.s32 32, %v1375_v40  ;;  %v1378_v31 = vshll.u32 %v2503_v33, %v1375_v40  ;;  %v1316_v26 = vadd.s32 1, %v3329_v61 }
  0xff   : > { %v3349_v56 = vshrl.u32 %v1373_v27, 5  ;;  %v1381_v25 = vshll.u32 %v2504_v35, %v1375_v40  ;;  %v1384_v32 = vshll.u32 %v2505_v37, %v1375_v40  ;;  %vm1146_vm10 = vcmp.lt.s32.totalorder %v3277_v48, 2 }
 0x100   : > { %v1234_v10 = vor.u32 4788187, %v1233_v28  ;;  %v1237_v51 = vcvt.s32.f32 %v1230_v60  ;;  %v1379_v47 = vshrl.u32 %v2504_v35, %v1376_v53  ;;  %v1387_v43 = vshll.u32 %v2506_v39, %v1375_v40 }
 0x101   : > { %v1242_v12 = vsel %vm1157_vm5, %v1241_v22, %v3284_v50  ;;  %vm1315_vm11 = vc.u32 %v3337_v9, %v3328_v59  ;;  %v1382_v34 = vshrl.u32 %v2505_v37, %v1376_v53  ;;  %v1385_v7 = vshrl.u32 %v2506_v39, %v1376_v53 }
 0x102   : > { %v1235_v14 = vand.u32 2147483647, %v1234_v10  ;;  %v1317_v62 = vsel %vm1315_vm11, %v1316_v26, %v3329_v61  ;;  %v1380_v36 = vor.u32 %v1379_v47, %v1378_v31  ;;  %v1388_v8 = vshrl.u32 %v2507_v41, %v1376_v53 }
 0x103   : > { %vm1260_vm12 = vcmp.lt.s32.totalorder %v3141_v19, 0  ;;  %v1318_v35 = vadd.s32 %v1317_v62, %v1313_v46  ;;  %v1383_v11 = vor.u32 %v1382_v34, %v1381_v25  ;;  %v1386_v27 = vor.u32 %v1385_v7, %v1384_v32 }
 0x104   : > { %vm1393_vm15 = vcmp.lt.s32.totalorder %v3349_v56, 1  ;;  %vm1144_vm1 = vweird.f32 %v3053_v45  ;;  %v1238_v50 = vmul.f32 %v1237_v51, %v1235_v14  ;;  %v1389_v42 = vor.u32 %v1388_v8, %v1387_v43  ;;  %v2399_v30 = vpop.eup %2398 }
 0x105   : > { %v1390_v37 = vshll.u32 %v2507_v41, %v1375_v40  ;;  %v1391_v39 = vshrl.u32 %v2508_v49, %v1376_v53  ;;  %v1319_v16 = vadd.s32 536870912, %v1318_v35  ;;  %vm1394_vm0 = vcmp.lt.s32.totalorder %v3349_v56, 2  ;;  %v2401_v38 = vpop.eup %2400 }
 0x106   : > { %vm1395_vm13 = vcmp.lt.s32.totalorder %v3349_v56, 3  ;;  %vm1396_vm14 = vcmp.lt.s32.totalorder %v3349_v56, 4  ;;  %v1151_v18 = vxor.u32 2147483648, %v2399_v30  ;;  %v1239_v0 = vxor.u32 2147483648, %v1238_v50 }
 0x107   : > { %vm3377_vm2 = vcmp.le.f32.partialorder %v1258_v54, 0.7853982  ;;  %v1377_v41 = vshrl.u32 %v2503_v33, %v1376_v53  ;;  %v1401_v49 = vsel %vm1393_vm15, %v1380_v36, %v1383_v11  ;;  %v1148_v23 = vxor.u32 2147483648, %v2401_v38 }
 0x108   : > { %v1320_v5 = vshrl.u32 %v1319_v16, 30  ;;  %v1398_v17 = vsel %vm1396_vm14, %v1386_v27, 2102212464  ;;  %v1402_v58 = vsel %vm1396_vm14, %v1389_v42, 920167782  ;;  %v1152_v63 = vsel %vm1150_vm7, %v1151_v18, %v2401_v38 }
 0x109   : > { %v1240_v54 = vsel %vm1157_vm5, %v1239_v0, %v1238_v50  ;;  %v1392_v61 = vor.u32 %v1391_v39, %v1390_v37  ;;  %v1403_v33 = vsel %vm1395_vm13, %v1386_v27, %v1402_v58  ;;  %v1149_v3 = vsel %vm1147_vm8, %v2399_v30, %v1148_v23 }
 0x10a   : > { %v1243_v29 = vsel %vm3343_vm9, %v3103_v4, %v1240_v54  ;;  %v1321_v40 = vshll.u32 %v1320_v5, 30  ;;  %v1344_v22 = vsub.s32 4, %v1320_v5  ;;  %v1397_v6 = vsel %vm1393_vm15, %v1377_v41, %v1380_v36 }
 0x10b   : > { %2402 = vcosq.f32 %v1243_v29  ;;  %v1399_v46 = vsel %vm1395_vm13, %v1383_v11, %v1398_v17  ;;  %v1404_v60 = vsel %vm1394_vm0, %v1401_v49, %v1403_v33  ;;  %v1153_v28 = vsel %vm1146_vm10, %v1149_v3, %v1152_v63 }
 0x10c   : > { %2404 = vsinq.f32 %v1243_v29  ;;  %v3409_v53 = vsub.s32 %v1318_v35, %v1321_v40  ;;  %v1405_v31 = vsel %vm1393_vm15, %v1383_v11, %v1386_v27  ;;  %v1345_v26 = vsel %vm1260_vm12, %v1344_v22, %v1320_v5 }
 0x10d   : > { %v1406_v25 = vsel %vm1396_vm14, %v1392_v61, 1326507024  ;;  %v3418_v32 = vmul.u32.u64.low %v3296_v57, %v1404_v60  ;;  %v3419_v10 = vmul.u32.u64.high %v3296_v57, %v1404_v60, %v3418_v32  ;;  %v1244_v48 = vsel %vm3343_vm9, 0, %v1242_v12 }
 0x10e   : > { %v1324_v51 = vsub.s32 0, %v3409_v53  ;;  %v1407_v47 = vsel %vm1395_vm13, %v1389_v42, %v1406_v25  ;;  %v3428_v43 = vstv %s3373_s24  ;;  %v1248_v34 = vand.u32 3, %v1244_v48 }
 0x10f   : > { %v1408_v7 = vsel %vm1394_vm0, %v1405_v31, %v1407_v47  ;;  %vm1560_vm3 = vcmp.eq.s32.totalorder %v3312_v24, 0  ;;  %vm1563_vm4 = vcmp.eq.s32.totalorder %v3312_v24, 2  ;;  %v3436_v15 = vsel %vm1144_vm1, nan, %v1153_v28 }
 0x110   : > { %vm1247_vm5 = vweird.f32 %v3103_v4  ;;  %v2288_v12 = vmin.u32 %v1324_v51, %v3409_v53  ;;  %v3442_v14 = vsel %vm3377_vm2, 0, %v1345_v26  ;;  %v1400_v62 = vsel %vm1394_vm0, %v1397_v6, %v1399_v46 }
 0x111   : > { %v3447_v36 = vmul.u32.u64.low %v3296_v57, %v1408_v7  ;;  %v3448_v8 = vmul.u32.u64.high %v3296_v57, %v1408_v7, %v3447_v36  ;;  %v1419_v35 = vadd.s32 1, %v3419_v10  ;;  %vm1559_vm6 = vcmp.lt.s32.totalorder %v3312_v24, 2 }
 0x112   : > { %v1326_v11 = vclz %v2288_v12  ;;  %v1562_v27 = vsel %vm1560_vm3, %v2399_v30, %v1148_v23  ;;  %v1565_v50 = vsel %vm1563_vm4, %v1151_v18, %v2401_v38  ;;  %v1661_v42 = vadd.s32 3, %v1244_v48 }
 0x113   : > { %vm1249_vm7 = vcmp.lt.s32.totalorder %v1248_v34, 2  ;;  %vm1250_vm8 = vcmp.eq.s32.totalorder %v1248_v34, 0  ;;  %v1416_v37 = vmul.u32 %v3296_v57, %v1400_v62  ;;  %v3454_v39 = vstv %s3405_s1 }
 0x114   : > { %vm1253_vm9 = vcmp.eq.s32.totalorder %v1248_v34, 2  ;;  %v1314_v56 = vadd.s32 %v3328_v59, %v3337_v9  ;;  %v2289_v16 = vadd.s32 4294967294, %v1326_v11  ;;  %v1662_v0 = vand.u32 3, %v1661_v42 }
 0x115   : > { %v2403_v41 = vpop.eup %2402  ;;  %vm1418_vm10 = vc.u32 %v3448_v8, %v3418_v32  ;;  %v1566_v30 = vsel %vm1559_vm6, %v1562_v27, %v1565_v50  ;;  %v1765_v38 = vadd.s32 3, %v3442_v14  ;;  %v1882_v57 = vmul.f32 %v3428_v43, %v3436_v15 }
 0x116   : > { %v2405_v18 = vpop.eup %2404  ;;  %v1254_v49 = vxor.u32 2147483648, %v2403_v41  ;;  %vm2290_vm11 = vcmp.lt.s32.totalorder %v2289_v16, 0  ;;  %vm1363_vm15 = vcmp.lt.s32.totalorder %v3144_v2, 0  ;;  %v1420_v59 = vsel %vm1418_vm10, %v1419_v35, %v3419_v10 }
 0x117   : > { %vm1663_vm0 = vcmp.lt.s32.totalorder %v1662_v0, 2  ;;  %v1251_v9 = vxor.u32 2147483648, %v2405_v18  ;;  %v1329_v23 = vsel %vm2290_vm11, 0, %v2289_v16  ;;  %vm3469_vm13 = vcmp.le.f32.partialorder %v1361_v20, 0.7853982 }
 0x118   : > { %v1421_v5 = vadd.s32 %v1420_v59, %v1416_v37  ;;  %vm1664_vm14 = vcmp.eq.s32.totalorder %v1662_v0, 0  ;;  %v1255_v17 = vsel %vm1253_vm9, %v1254_v49, %v2405_v18  ;;  %v1330_v58 = vsub.s32 32, %v1329_v23 }
 0x119   : > { %v1331_v63 = vshll.u32 %v3409_v53, %v1329_v23  ;;  %v1334_v54 = vsub.s32 4294967266, %v1329_v23  ;;  %v1252_v61 = vsel %vm1250_vm8, %v2403_v41, %v1251_v9  ;;  %v1666_v3 = vsel %vm1664_vm14, %v2403_v41, %v1251_v9 }
 0x11a   : > { %v1422_v33 = vadd.s32 536870912, %v1421_v5  ;;  %vm1667_vm3 = vcmp.eq.s32.totalorder %v1662_v0, 2  ;;  %v1256_v20 = vsel %vm1249_vm7, %v1252_v61, %v1255_v17  ;;  %v1332_v29 = vshrl.u32 %v1314_v56, %v1330_v58 }
 0x11b   : > { %v1335_v40 = vadd.s32 127, %v1334_v54  ;;  %v1669_v22 = vsel %vm1667_vm3, %v1254_v49, %v2405_v18  ;;  %v3481_v6 = vsel %vm1247_vm5, nan, %v1256_v20  ;;  %v1900_v28 = vmul.f32 %v3436_v15, %v3436_v15 }
 0x11c   : > { %v1423_v46 = vshrl.u32 %v1422_v33, 30  ;;  %v1670_v60 = vsel %vm1663_vm0, %v1666_v3, %v1669_v22  ;;  %v1333_v53 = vor.u32 %v1332_v29, %v1331_v63  ;;  %v3488_v26 = vsel %vm1144_vm1, nan, %v1566_v30 }
 0x11d   : > { %v1336_v31 = vshll.u32 %v1335_v40, 23  ;;  %v1886_v25 = vadd.f32 %v1882_v57, %v3232_v44  ;;  %v3493_v51 = vsel %vm1247_vm5, nan, %v1670_v60  ;;  %v1883_v47 = vmul.f32 %v3428_v43, %v3481_v6 }
 0x11e   : > { %v1424_v10 = vshll.u32 %v1423_v46, 30  ;;  %v1447_v48 = vsub.s32 4, %v1423_v46  ;;  %v1340_v7 = vcvt.s32.f32 %v1333_v53  ;;  %v1892_v45 = vmul.f32 %v3454_v39, %v3488_v26 }
 0x11f   : > { %v1337_v34 = vor.u32 4788187, %v1336_v31  ;;  %v1893_v44 = vmul.f32 %v3454_v39, %v3493_v51  ;;  %v1887_v62 = vadd.f32 %v1883_v47, %v3244_v52  ;;  %v1901_v36 = vmul.f32 %v3481_v6, %v3481_v6 }
 0x120   : > { %v3503_v12 = vsub.s32 %v1421_v5, %v1424_v10  ;;  %v1448_v4 = vsel %vm1363_vm15, %v1447_v48, %v1423_v46  ;;  %v1904_v27 = vmul.f32 %v3488_v26, %v3488_v26  ;;  %v1905_v50 = vmul.f32 %v3493_v51, %v3493_v51 }
 0x121   : > { %v1338_v35 = vand.u32 2147483647, %v1337_v34  ;;  %v1450_v11 = vsel %vm3469_vm13, 0, %v1448_v4  ;;  %v3518_v42 = vadd.f32 %v3261_v1, %v3269_v13  ;;  %v3522_v56 = vstv %s3476_s25 }
 0x122   : > { %v1427_v37 = vsub.s32 0, %v3503_v12  ;;  %v1869_v52 = vadd.s32 3, %v1450_v11  ;;  %v1908_v0 = vsub.f32 %v1900_v28, %v1904_v27  ;;  %v1909_v41 = vsub.f32 %v1901_v36, %v1905_v50 }
 0x123   : > { %v1341_v16 = vmul.f32 %v1340_v7, %v1338_v35  ;;  %v1912_v30 = vmul.f32 %v3488_v26, %v3436_v15  ;;  %v3527_v57 = vand.u32 3, %v3442_v14  ;;  %v3530_v49 = vand.u32 3, %v1765_v38 }
 0x124   : > { %v2292_v18 = vmin.u32 %v1427_v37, %v3503_v12  ;;  %v1896_v1 = vadd.f32 %v1892_v45, %v1886_v25  ;;  %v1417_v59 = vadd.s32 %v3418_v32, %v3448_v8  ;;  %v1897_v9 = vadd.f32 %v1893_v44, %v1887_v62 }
 0x125   : > { %v1342_v13 = vxor.u32 2147483648, %v1341_v16  ;;  %v1913_v23 = vmul.f32 %v3493_v51, %v3481_v6  ;;  %v1922_v17 = vmul.f32 %v3522_v56, %v1908_v0  ;;  %v1923_v58 = vmul.f32 %v3522_v56, %v1909_v41 }
 0x126   : > { %v1429_v5 = vclz %v2292_v18  ;;  %v3539_v14 = vstv %s3497_s26  ;;  %v3543_v63 = vand.u32 3, %v1450_v11  ;;  %v3545_v54 = vand.u32 3, %v1869_v52 }
 0x127   : > { %v1343_v38 = vsel %vm1260_vm12, %v1342_v13, %v1341_v16  ;;  %v1916_v61 = vadd.f32 %v1912_v30, %v1912_v30  ;;  %v1917_v33 = vadd.f32 %v1913_v23, %v1913_v23  ;;  %v1926_v3 = vadd.f32 %v1922_v17, %v1896_v1 }
 0x128   : > { %v1346_v32 = vsel %vm3377_vm2, %v3141_v19, %v1343_v38  ;;  %v2293_v8 = vadd.s32 4294967294, %v1429_v5  ;;  %v1927_v20 = vadd.f32 %v1923_v58, %v1897_v9  ;;  %v1940_v40 = vmul.f32 %v1908_v0, %v3436_v15 }
 0x129   : > { %2406 = vcosq.f32 %v1346_v32  ;;  %v1932_v29 = vmul.f32 %v3539_v14, %v1916_v61  ;;  %v1933_v22 = vmul.f32 %v3539_v14, %v1917_v33  ;;  %v1941_v46 = vmul.f32 %v1909_v41, %v3481_v6 }
 0x12a   : > { %2408 = vsinq.f32 %v1346_v32  ;;  %vm2294_vm12 = vcmp.lt.s32.totalorder %v2293_v8, 0  ;;  %vm1356_vm1 = vcmp.eq.s32.totalorder %v3527_v57, 2  ;;  %vm1771_vm2 = vcmp.eq.s32.totalorder %v3530_v49, 2 }
 0x12b   : > { %v1432_v60 = vsel %vm2294_vm12, 0, %v2293_v8  ;;  %v1936_v55 = vadd.f32 %v1932_v29, %v1926_v3  ;;  %v1944_v28 = vmul.f32 %v1916_v61, %v3488_v26  ;;  %v1945_v53 = vmul.f32 %v1917_v33, %v3493_v51 }
 0x12c   : > { %vm1353_vm4 = vcmp.eq.s32.totalorder %v3527_v57, 0  ;;  %v1433_v31 = vsub.s32 32, %v1432_v60  ;;  %v1434_v25 = vshll.u32 %v3503_v12, %v1432_v60  ;;  %v1437_v10 = vsub.s32 4294967266, %v1432_v60 }
 0x12d   : > { %vm1768_vm5 = vcmp.eq.s32.totalorder %v3530_v49, 0  ;;  %v1937_v48 = vadd.f32 %v1933_v22, %v1927_v20  ;;  %vm1352_vm6 = vcmp.lt.s32.totalorder %v3527_v57, 2  ;;  %vm1767_vm7 = vcmp.lt.s32.totalorder %v3530_v49, 2 }
 0x12e   : > { %v1948_v47 = vsub.f32 %v1940_v40, %v1944_v28  ;;  %v1949_v34 = vsub.f32 %v1941_v46, %v1945_v53  ;;  %v1952_v7 = vmul.f32 %v1916_v61, %v3436_v15  ;;  %v1953_v45 = vmul.f32 %v1917_v33, %v3481_v6 }
 0x12f   : > { %vm1350_vm8 = vweird.f32 %v3141_v19  ;;  %v1435_v44 = vshrl.u32 %v1417_v59, %v1433_v31  ;;  %v1438_v4 = vadd.s32 127, %v1437_v10  ;;  %v1956_v12 = vmul.f32 %v1908_v0, %v3488_v26 }
 0x130   : > { %v1957_v62 = vmul.f32 %v1909_v41, %v3493_v51  ;;  %v3573_v36 = vstv %s3547_s27  ;;  %v3576_v35 = vstv %s3549_s28  ;;  %v1984_v11 = vmul.f32 %v1948_v47, %v3436_v15 }
 0x131   : > { %v1985_v27 = vmul.f32 %v1949_v34, %v3481_v6  ;;  %v1436_v50 = vor.u32 %v1435_v44, %v1434_v25  ;;  %v1439_v37 = vshll.u32 %v1438_v4, 23  ;;  %v1960_v52 = vadd.f32 %v1956_v12, %v1952_v7 }
 0x132   : > { %v1961_v16 = vadd.f32 %v1957_v62, %v1953_v45  ;;  %v1966_v30 = vmul.f32 %v3573_v36, %v1948_v47  ;;  %v1967_v0 = vmul.f32 %v3573_v36, %v1949_v34  ;;  %v2000_v41 = vmul.f32 %v1948_v47, %v3488_v26 }
 0x133   : > { %v2001_v18 = vmul.f32 %v1949_v34, %v3493_v51  ;;  %v1440_v1 = vor.u32 4788187, %v1439_v37  ;;  %v1443_v13 = vcvt.s32.f32 %v1436_v50  ;;  %v1976_v59 = vmul.f32 %v3576_v35, %v1960_v52  ;;  %v2407_v23 = vpop.eup %2406 }
 0x134   : > { %v1977_v9 = vmul.f32 %v3576_v35, %v1961_v16  ;;  %v1970_v5 = vadd.f32 %v1966_v30, %v1936_v55  ;;  %v1971_v17 = vadd.f32 %v1967_v0, %v1937_v48  ;;  %v1988_v58 = vmul.f32 %v1960_v52, %v3488_v26  ;;  %v2409_v61 = vpop.eup %2408 }
 0x135   : > { %v1989_v38 = vmul.f32 %v1961_v16, %v3493_v51  ;;  %v1357_v32 = vxor.u32 2147483648, %v2407_v23  ;;  %v1441_v8 = vand.u32 2147483647, %v1440_v1  ;;  %v1996_v33 = vmul.f32 %v1960_v52, %v3436_v15 }
 0x136   : > { %v1997_v3 = vmul.f32 %v1961_v16, %v3481_v6  ;;  %v1354_v20 = vxor.u32 2147483648, %v2409_v61  ;;  %v1980_v29 = vadd.f32 %v1976_v59, %v1970_v5  ;;  %v1981_v40 = vadd.f32 %v1977_v9, %v1971_v17 }
 0x137   : > { %v1992_v22 = vsub.f32 %v1984_v11, %v1988_v58  ;;  %v1358_v46 = vsel %vm1356_vm1, %v1357_v32, %v2409_v61  ;;  %v1444_v60 = vmul.f32 %v1443_v13, %v1441_v8  ;;  %v1773_v55 = vsel %vm1771_vm2, %v1357_v32, %v2409_v61 }
 0x138   : > { %v3598_v28 = vsub.f32 %v1985_v27, %v1989_v38  ;;  %v1355_v53 = vsel %vm1353_vm4, %v2407_v23, %v1354_v20  ;;  %v1770_v31 = vsel %vm1768_vm5, %v2407_v23, %v1354_v20  ;;  %v2004_v25 = vadd.f32 %v2000_v41, %v1996_v33 }
 0x139   : > { %v2005_v10 = vadd.f32 %v2001_v18, %v1997_v3  ;;  %v1359_v48 = vsel %vm1352_vm6, %v1355_v53, %v1358_v46  ;;  %v1445_v47 = vxor.u32 2147483648, %v1444_v60  ;;  %v1774_v34 = vsel %vm1767_vm7, %v1770_v31, %v1773_v55 }
 0x13a   : > { %v3609_v7 = vstv %s3580_s29  ;;  %v3613_v45 = vsel %vm1350_vm8, nan, %v1359_v48  ;;  %v3617_v44 = vsel %vm1350_vm8, nan, %v1774_v34  ;;  %v3639_v30 = vstv %s3592_s30 }
 0x13b   : > { %v2010_v4 = vmul.f32 %v3609_v7, %v1992_v22  ;;  %v2011_v57 = vmul.f32 %v3609_v7, %v3598_v28  ;;  %v1446_v49 = vsel %vm1363_vm15, %v1445_v47, %v1444_v60  ;;  %v1884_v12 = vmul.f32 %v3428_v43, %v3613_v45 }
 0x13c   : > { %v1894_v62 = vmul.f32 %v3454_v39, %v3617_v44  ;;  %v1902_v11 = vmul.f32 %v3613_v45, %v3613_v45  ;;  %v1449_v19 = vsel %vm3469_vm13, %v3144_v2, %v1446_v49  ;;  %v1906_v27 = vmul.f32 %v3617_v44, %v3617_v44 }
 0x13d   : > { %v1914_v50 = vmul.f32 %v3617_v44, %v3613_v45  ;;  %v2014_v37 = vadd.f32 %v2010_v4, %v1980_v29  ;;  %2410 = vcosq.f32 %v1449_v19  ;;  %v1888_v52 = vadd.f32 %v1884_v12, %v3254_v21 }
 0x13e   : > { %v2015_v16 = vadd.f32 %v2011_v57, %v1981_v40  ;;  %2412 = vsinq.f32 %v1449_v19  ;;  %v1910_v0 = vsub.f32 %v1902_v11, %v1906_v27  ;;  %v2020_v18 = vmul.f32 %v3639_v30, %v2004_v25 }
 0x13f   : > { %v1918_v41 = vadd.f32 %v1914_v50, %v1914_v50  ;;  %vm1459_vm9 = vcmp.eq.s32.totalorder %v3543_v63, 2  ;;  %vm1875_vm10 = vcmp.eq.s32.totalorder %v3545_v54, 2  ;;  %v1898_v24 = vadd.f32 %v1894_v62, %v1888_v52 }
 0x140   : > { %v2021_v1 = vmul.f32 %v3639_v30, %v2005_v10  ;;  %v2028_v13 = vmul.f32 %v1992_v22, %v3436_v15  ;;  %v2029_v21 = vmul.f32 %v3598_v28, %v3481_v6  ;;  %vm1456_vm11 = vcmp.eq.s32.totalorder %v3543_v63, 0 }
 0x141   : > { %vm1872_vm15 = vcmp.eq.s32.totalorder %v3545_v54, 0  ;;  %v1924_v59 = vmul.f32 %v3522_v56, %v1910_v0  ;;  %v1934_v9 = vmul.f32 %v3539_v14, %v1918_v41  ;;  %v1942_v23 = vmul.f32 %v1910_v0, %v3613_v45 }
 0x142   : > { %v1946_v5 = vmul.f32 %v1918_v41, %v3617_v44  ;;  %vm1455_vm0 = vcmp.lt.s32.totalorder %v3543_v63, 2  ;;  %vm1871_vm13 = vcmp.lt.s32.totalorder %v3545_v54, 2  ;;  %v1954_v17 = vmul.f32 %v1918_v41, %v3613_v45 }
 0x143   : > { %v1958_v58 = vmul.f32 %v1910_v0, %v3617_v44  ;;  %v2024_v38 = vadd.f32 %v2020_v18, %v2014_v37  ;;  %v2025_v61 = vadd.f32 %v2021_v1, %v2015_v16  ;;  %vm1453_vm14 = vweird.f32 %v3144_v2 }
 0x144   : > { %v1928_v32 = vadd.f32 %v1924_v59, %v1898_v24  ;;  %v1950_v8 = vsub.f32 %v1942_v23, %v1946_v5  ;;  %v2032_v33 = vmul.f32 %v2004_v25, %v3488_v26  ;;  %v2033_v3 = vmul.f32 %v2005_v10, %v3493_v51 }
 0x145   : > { %v1962_v20 = vadd.f32 %v1958_v58, %v1954_v17  ;;  %v2040_v29 = vmul.f32 %v2004_v25, %v3436_v15  ;;  %v2041_v40 = vmul.f32 %v2005_v10, %v3481_v6  ;;  %v2044_v46 = vmul.f32 %v1992_v22, %v3488_v26 }
 0x146   : > { %v1938_v60 = vadd.f32 %v1934_v9, %v1928_v32  ;;  %v1968_v55 = vmul.f32 %v3573_v36, %v1950_v8  ;;  %v1986_v53 = vmul.f32 %v1950_v8, %v3613_v45  ;;  %v2002_v31 = vmul.f32 %v1950_v8, %v3617_v44 }
 0x147   : > { %v1978_v48 = vmul.f32 %v3576_v35, %v1962_v20  ;;  %v1990_v47 = vmul.f32 %v1962_v20, %v3617_v44  ;;  %v1998_v34 = vmul.f32 %v1962_v20, %v3613_v45  ;;  %v3674_v25 = vsub.f32 %v2028_v13, %v2032_v33  ;;  %v2411_v49 = vpop.eup %2410 }
 0x148   : > { %v1972_v10 = vadd.f32 %v1968_v55, %v1938_v60  ;;  %v3676_v4 = vsub.f32 %v2029_v21, %v2033_v3  ;;  %v2045_v22 = vmul.f32 %v3598_v28, %v3493_v51  ;;  %v3680_v57 = vadd.f32 %v2044_v46, %v2040_v29  ;;  %v2413_v27 = vpop.eup %2412 }
 0x149   : > { %v1994_v12 = vsub.f32 %v1986_v53, %v1990_v47  ;;  %v2006_v62 = vadd.f32 %v2002_v31, %v1998_v34  ;;  %v3683_v11 = vstv %s3648_s4  ;;  %v3686_v19 = vstv %s3650_s5 }
 0x14a   : > { %v1460_v50 = vxor.u32 2147483648, %v2411_v49  ;;  %v1982_v37 = vadd.f32 %v1978_v48, %v1972_v10  ;;  %v3688_v52 = vadd.f32 %v2045_v22, %v2041_v40  ;;  %v2054_v16 = vmul.f32 %v3683_v11, %v3674_v25 }
 0x14b   : > { %v1457_v0 = vxor.u32 2147483648, %v2413_v27  ;;  %v2012_v28 = vmul.f32 %v3609_v7, %v1994_v12  ;;  %v2022_v41 = vmul.f32 %v3639_v30, %v2006_v62  ;;  %v2030_v18 = vmul.f32 %v1994_v12, %v3613_v45 }
 0x14c   : > { %v1461_v24 = vsel %vm1459_vm9, %v1460_v50, %v2413_v27  ;;  %v1877_v1 = vsel %vm1875_vm10, %v1460_v50, %v2413_v27  ;;  %v2034_v13 = vmul.f32 %v2006_v62, %v3617_v44  ;;  %v2042_v21 = vmul.f32 %v2006_v62, %v3613_v45 }
 0x14d   : > { %v1458_v59 = vsel %vm1456_vm11, %v2411_v49, %v1457_v0  ;;  %v1874_v9 = vsel %vm1872_vm15, %v2411_v49, %v1457_v0  ;;  %v2016_v23 = vadd.f32 %v2012_v28, %v1982_v37  ;;  %v2046_v5 = vmul.f32 %v1994_v12, %v3617_v44 }
 0x14e   : > { %v1462_v17 = vsel %vm1455_vm0, %v1458_v59, %v1461_v24  ;;  %v1878_v58 = vsel %vm1871_vm13, %v1874_v9, %v1877_v1  ;;  %v3710_v32 = vsub.f32 %v2030_v18, %v2034_v13  ;;  %v2055_v8 = vmul.f32 %v3683_v11, %v3676_v4 }
 0x14f   : > { %v3716_v33 = vsel %vm1453_vm14, nan, %v1462_v17  ;;  %v3720_v3 = vsel %vm1453_vm14, nan, %v1878_v58  ;;  %v2026_v20 = vadd.f32 %v2022_v41, %v2016_v23  ;;  %v2050_v29 = vadd.f32 %v2046_v5, %v2042_v21 }
 0x150   : > { %v1885_v63 = vmul.f32 %v3428_v43, %v3716_v33  ;;  %v1895_v54 = vmul.f32 %v3454_v39, %v3720_v3  ;;  %v1903_v40 = vmul.f32 %v3716_v33, %v3716_v33  ;;  %v1907_v46 = vmul.f32 %v3720_v3, %v3720_v3 }
 0x151   : > { %v1915_v60 = vmul.f32 %v3720_v3, %v3716_v33  ;;  %v2056_v2 = vmul.f32 %v3683_v11, %v3710_v32  ;;  %v2058_v55 = vadd.f32 %v2054_v16, %v2024_v38  ;;  %v2059_v53 = vadd.f32 %v2055_v8, %v2025_v61 }
 0x152   : > { %v1889_v31 = vadd.f32 %v1885_v63, %v3518_v42  ;;  %v1911_v43 = vsub.f32 %v1903_v40, %v1907_v46  ;;  %v2064_v39 = vmul.f32 %v3686_v19, %v3680_v57  ;;  %v2065_v48 = vmul.f32 %v3686_v19, %v3688_v52 }
 0x153   : > { %v1919_v47 = vadd.f32 %v1915_v60, %v1915_v60  ;;  %v2060_v34 = vadd.f32 %v2056_v2, %v2026_v20  ;;  %v2066_v10 = vmul.f32 %v3686_v19, %v2050_v29  ;;  %v2072_v22 = vmul.f32 %v3674_v25, %v3436_v15 }
 0x154   : > { %v1899_v49 = vadd.f32 %v1895_v54, %v1889_v31  ;;  %v1925_v38 = vmul.f32 %v3522_v56, %v1911_v43  ;;  %v1943_v61 = vmul.f32 %v1911_v43, %v3716_v33  ;;  %v1959_v42 = vmul.f32 %v1911_v43, %v3720_v3 }
 0x155   : > { %v1935_v12 = vmul.f32 %v3539_v14, %v1919_v47  ;;  %v1947_v62 = vmul.f32 %v1919_v47, %v3720_v3  ;;  %v1955_v27 = vmul.f32 %v1919_v47, %v3716_v33  ;;  %v2068_v50 = vadd.f32 %v2064_v39, %v2058_v55 }
 0x156   : > { %v1929_v37 = vadd.f32 %v1925_v38, %v1899_v49  ;;  %v2069_v16 = vadd.f32 %v2065_v48, %v2059_v53  ;;  %v2070_v0 = vadd.f32 %v2066_v10, %v2060_v34  ;;  %v2073_v28 = vmul.f32 %v3676_v4, %v3481_v6 }
 0x157   : > { %v1951_v41 = vsub.f32 %v1943_v61, %v1947_v62  ;;  %v1963_v18 = vadd.f32 %v1959_v42, %v1955_v27  ;;  %v2074_v56 = vmul.f32 %v3710_v32, %v3613_v45  ;;  %v2076_v24 = vmul.f32 %v3680_v57, %v3488_v26 }
 0x158   : > { %v1939_v14 = vadd.f32 %v1935_v12, %v1929_v37  ;;  %v2077_v1 = vmul.f32 %v3688_v52, %v3493_v51  ;;  %v2078_v13 = vmul.f32 %v2050_v29, %v3617_v44  ;;  %v2084_v21 = vmul.f32 %v3680_v57, %v3436_v15 }
 0x159   : > { %v1969_v59 = vmul.f32 %v3573_v36, %v1951_v41  ;;  %v1979_v9 = vmul.f32 %v3576_v35, %v1963_v18  ;;  %v1987_v23 = vmul.f32 %v1951_v41, %v3716_v33  ;;  %v1991_v5 = vmul.f32 %v1963_v18, %v3720_v3 }
 0x15a   : > { %v1999_v17 = vmul.f32 %v1963_v18, %v3716_v33  ;;  %v2003_v58 = vmul.f32 %v1951_v41, %v3720_v3  ;;  %v3769_v8 = vsub.f32 %v2072_v22, %v2076_v24  ;;  %v3771_v20 = vsub.f32 %v2073_v28, %v2077_v1 }
 0x15b   : > { %v1973_v63 = vadd.f32 %v1969_v59, %v1939_v14  ;;  %v1995_v57 = vsub.f32 %v1987_v23, %v1991_v5  ;;  %v3773_v54 = vsub.f32 %v2074_v56, %v2078_v13  ;;  %v2085_v36 = vmul.f32 %v3688_v52, %v3481_v6 }
 0x15c   : > { %v2007_v35 = vadd.f32 %v2003_v58, %v1999_v17  ;;  %v2086_v40 = vmul.f32 %v2050_v29, %v3613_v45  ;;  %v2088_v46 = vmul.f32 %v3674_v25, %v3488_v26  ;;  %v2089_v60 = vmul.f32 %v3676_v4, %v3493_v51 }
 0x15d   : > { %v1983_v2 = vadd.f32 %v1979_v9, %v1973_v63  ;;  %v2013_v55 = vmul.f32 %v3609_v7, %v1995_v57  ;;  %v2031_v53 = vmul.f32 %v1995_v57, %v3716_v33  ;;  %v2047_v31 = vmul.f32 %v1995_v57, %v3720_v3 }
 0x15e   : > { %v2023_v52 = vmul.f32 %v3639_v30, %v2007_v35  ;;  %v2035_v43 = vmul.f32 %v2007_v35, %v3720_v3  ;;  %v2043_v29 = vmul.f32 %v2007_v35, %v3716_v33  ;;  %v2090_v25 = vmul.f32 %v3710_v32, %v3617_v44 }
 0x15f   : > { %v2017_v39 = vadd.f32 %v2013_v55, %v1983_v2  ;;  %v2092_v48 = vadd.f32 %v2088_v46, %v2084_v21  ;;  %v2093_v4 = vadd.f32 %v2089_v60, %v2085_v36  ;;  %v2097_v47 = vstv %s3754_s0 }
 0x160   : > { %v2039_v34 = vsub.f32 %v2031_v53, %v2035_v43  ;;  %v2051_v7 = vadd.f32 %v2047_v31, %v2043_v29  ;;  %v2094_v10 = vadd.f32 %v2090_v25, %v2086_v40  ;;  %v2098_v22 = vmul.f32 %v2097_v47, %v3769_v8 }
 0x161   : > { %v2027_v49 = vadd.f32 %v2023_v52, %v2017_v39  ;;  %v2099_v38 = vmul.f32 %v2097_v47, %v3771_v20  ;;  %v2100_v30 = vmul.f32 %v2097_v47, %v3773_v54  ;;  %v2107_v61 = vstv %s3765_s6 }
 0x162   : > { %v2057_v42 = vmul.f32 %v3683_v11, %v2039_v34  ;;  %v2067_v12 = vmul.f32 %v3686_v19, %v2051_v7  ;;  %v2075_v32 = vmul.f32 %v2039_v34, %v3716_v33  ;;  %v2079_v62 = vmul.f32 %v2051_v7, %v3720_v3 }
 0x163   : > { %v2087_v27 = vmul.f32 %v2051_v7, %v3716_v33  ;;  %v2091_v37 = vmul.f32 %v2039_v34, %v3720_v3  ;;  %v2102_v28 = vadd.f32 %v2098_v22, %v2068_v50  ;;  %v2103_v41 = vadd.f32 %v2099_v38, %v2069_v16 }
 0x164   : > { %v2061_v18 = vadd.f32 %v2057_v42, %v2027_v49  ;;  %v2083_v56 = vsub.f32 %v2075_v32, %v2079_v62  ;;  %v2104_v24 = vadd.f32 %v2100_v30, %v2070_v0  ;;  %v2108_v14 = vmul.f32 %v2107_v61, %v2092_v48 }
 0x165   : > { %v2095_v1 = vadd.f32 %v2091_v37, %v2087_v27  ;;  %v2109_v11 = vmul.f32 %v2107_v61, %v2093_v4  ;;  %v2110_v13 = vmul.f32 %v2107_v61, %v2094_v10  ;;  %v2116_v59 = vmul.f32 %v3769_v8, %v3436_v15 }
 0x166   : > { %v2071_v19 = vadd.f32 %v2067_v12, %v2061_v18  ;;  %v2101_v21 = vmul.f32 %v2097_v47, %v2083_v56  ;;  %v2117_v9 = vmul.f32 %v3771_v20, %v3481_v6  ;;  %v2112_v50 = vadd.f32 %v2108_v14, %v2102_v28 }
 0x167   : > { %v2111_v23 = vmul.f32 %v2107_v61, %v2095_v1  ;;  %v2113_v16 = vadd.f32 %v2109_v11, %v2103_v41  ;;  %v2118_v0 = vmul.f32 %v3773_v54, %v3613_v45  ;;  %v2114_v5 = vadd.f32 %v2110_v13, %v2104_v24 }
 0x168   : > { %v2119_v17 = vmul.f32 %v2083_v56, %v3716_v33  ;;  %v2120_v58 = vmul.f32 %v2092_v48, %v3488_v26  ;;  %v2121_v63 = vmul.f32 %v2093_v4, %v3493_v51  ;;  %v2105_v57 = vadd.f32 %v2101_v21, %v2071_v19 }
 0x169   : > { %v2122_v36 = vmul.f32 %v2094_v10, %v3617_v44  ;;  %v2123_v35 = vmul.f32 %v2095_v1, %v3720_v3  ;;  %v2128_v40 = vmul.f32 %v2092_v48, %v3436_v15  ;;  %v2129_v2 = vmul.f32 %v2093_v4, %v3481_v6 }
 0x16a   : > { %v2124_v46 = vsub.f32 %v2116_v59, %v2120_v58  ;;  %v2125_v60 = vsub.f32 %v2117_v9, %v2121_v63  ;;  %v2130_v55 = vmul.f32 %v2094_v10, %v3613_v45  ;;  %v2131_v52 = vmul.f32 %v2095_v1, %v3716_v33 }
 0x16b   : > { %v2126_v53 = vsub.f32 %v2118_v0, %v2122_v36  ;;  %v2127_v31 = vsub.f32 %v2119_v17, %v2123_v35  ;;  %v2132_v43 = vmul.f32 %v3769_v8, %v3488_v26  ;;  %v2133_v29 = vmul.f32 %v3771_v20, %v3493_v51 }
 0x16c   : > { %v2134_v25 = vmul.f32 %v3773_v54, %v3617_v44  ;;  %v2135_v39 = vmul.f32 %v2083_v56, %v3720_v3  ;;  %v2141_v48 = vstv %s3801_s7  ;;  %v2115_v4 = vadd.f32 %v2111_v23, %v2105_v57 }
 0x16d   : > { %v2142_v47 = vmul.f32 %v2141_v48, %v2124_v46  ;;  %v2143_v34 = vmul.f32 %v2141_v48, %v2125_v60  ;;  %v2144_v7 = vmul.f32 %v2141_v48, %v2126_v53  ;;  %v2136_v10 = vadd.f32 %v2132_v43, %v2128_v40 }
 0x16e   : > { %v2137_v22 = vadd.f32 %v2133_v29, %v2129_v2  ;;  %v2138_v49 = vadd.f32 %v2134_v25, %v2130_v55  ;;  %v2145_v38 = vmul.f32 %v2141_v48, %v2127_v31  ;;  %v2151_v42 = vstv %s3809_s10 }
 0x16f   : > { %v2146_v30 = vadd.f32 %v2142_v47, %v2112_v50  ;;  %v2147_v8 = vadd.f32 %v2143_v34, %v2113_v16  ;;  %v2148_v61 = vadd.f32 %v2144_v7, %v2114_v5  ;;  %v2139_v20 = vadd.f32 %v2135_v39, %v2131_v52 }
 0x170   : > { %v2152_v54 = vmul.f32 %v2151_v42, %v2136_v10  ;;  %v2153_v12 = vmul.f32 %v2151_v42, %v2137_v22  ;;  %v2154_v32 = vmul.f32 %v2151_v42, %v2138_v49  ;;  %v2149_v62 = vadd.f32 %v2145_v38, %v2115_v4 }
 0x171   : > { %v2160_v27 = vmul.f32 %v2124_v46, %v3436_v15  ;;  %v2161_v37 = vmul.f32 %v2125_v60, %v3481_v6  ;;  %v2162_v28 = vmul.f32 %v2126_v53, %v3613_v45  ;;  %v2155_v41 = vmul.f32 %v2151_v42, %v2139_v20 }
 0x172   : > { %v2156_v18 = vadd.f32 %v2152_v54, %v2146_v30  ;;  %v2157_v56 = vadd.f32 %v2153_v12, %v2147_v8  ;;  %v2163_v24 = vmul.f32 %v2127_v31, %v3716_v33  ;;  %v2158_v14 = vadd.f32 %v2154_v32, %v2148_v61 }
 0x173   : > { %v2164_v1 = vmul.f32 %v2136_v10, %v3488_v26  ;;  %v2165_v11 = vmul.f32 %v2137_v22, %v3493_v51  ;;  %v2166_v13 = vmul.f32 %v2138_v49, %v3617_v44  ;;  %v2167_v19 = vmul.f32 %v2139_v20, %v3720_v3 }
 0x174   : > { %v2172_v21 = vmul.f32 %v2136_v10, %v3436_v15  ;;  %v2173_v59 = vmul.f32 %v2137_v22, %v3481_v6  ;;  %v2174_v9 = vmul.f32 %v2138_v49, %v3613_v45  ;;  %v2175_v0 = vmul.f32 %v2139_v20, %v3716_v33 }
 0x175   : > { %v2168_v23 = vsub.f32 %v2160_v27, %v2164_v1  ;;  %v2169_v50 = vsub.f32 %v2161_v37, %v2165_v11  ;;  %v2170_v16 = vsub.f32 %v2162_v28, %v2166_v13  ;;  %v2171_v5 = vsub.f32 %v2163_v24, %v2167_v19 }
 0x176   : > { %v2176_v17 = vmul.f32 %v2124_v46, %v3488_v26  ;;  %v2177_v58 = vmul.f32 %v2125_v60, %v3493_v51  ;;  %v2178_v63 = vmul.f32 %v2126_v53, %v3617_v44  ;;  %v2159_v57 = vadd.f32 %v2155_v41, %v2149_v62 }
 0x177   : > { %v2179_v36 = vmul.f32 %v2127_v31, %v3720_v3  ;;  %v2185_v15 = vstv %s3829_s11  ;;  %v2195_v35 = vstv %s3831_s13 }
 0x178   : > { %v2180_v6 = vadd.f32 %v2176_v17, %v2172_v21  ;;  %v2181_v40 = vadd.f32 %v2177_v58, %v2173_v59  ;;  %v2182_v45 = vadd.f32 %v2178_v63, %v2174_v9  ;;  %v2186_v2 = vmul.f32 %v2185_v15, %v2168_v23 }
 0x179   : > { %v2183_v55 = vadd.f32 %v2179_v36, %v2175_v0  ;;  %v2187_v52 = vmul.f32 %v2185_v15, %v2169_v50  ;;  %v2188_v33 = vmul.f32 %v2185_v15, %v2170_v16  ;;  %v2189_v43 = vmul.f32 %v2185_v15, %v2171_v5 }
 0x17a   : > { %v2190_v29 = vadd.f32 %v2186_v2, %v2156_v18  ;;  %v2196_v26 = vmul.f32 %v2195_v35, %v2180_v6  ;;  %v2197_v46 = vmul.f32 %v2195_v35, %v2181_v40  ;;  %v2198_v51 = vmul.f32 %v2195_v35, %v2182_v45  ;;  %56 = sbr.rel (!%p54_p2) target bundleno = 45 (0x2d), region = 53 }
 0x17b   : > { %v2191_v60 = vadd.f32 %v2187_v52, %v2157_v56  ;;  %v2192_v44 = vadd.f32 %v2188_v33, %v2158_v14  ;;  %v2193_v53 = vadd.f32 %v2189_v43, %v2159_v57  ;;  %v2199_v25 = vmul.f32 %v2195_v35, %v2183_v55 }
 0x17c   : > { %v2200_v3 = vadd.f32 %v2196_v26, %v2190_v29 }
 0x17d   : > { %v2201_v31 = vadd.f32 %v2197_v46, %v2191_v60  ;;  %v2202_v39 = vadd.f32 %v2198_v51, %v2192_v44  ;;  %v2203_v48 = vadd.f32 %v2199_v25, %v2193_v53 }
 0x17e   : > { %2206 = vst [vmem:[%s2205_s15] sm:$0xff] %v2200_v3 }
 0x17f   : > { %2207 = vst [vmem:[%s2205_s15 + $0x8] sm:$0xff] %v2201_v31  ;;  %2208 = vst [vmem:[%s2205_s15 + $0x10] sm:$0xff] %v2202_v39 }
 0x180   : > { %2209 = vst [vmem:[%s2205_s15 + $0x18] sm:$0xff] %v2203_v48 }
 0x181   :  { %2471 = shalt.err (!%p2468_p7)
}
 0x182   :  { %s2472_s19 = scalar_lea.hbm %s3874_s3, 4096 }
 0x183   :  { %p2473_p8 = scmp.ne.s32.totalorder %s3874_s3, %s2472_s19  ;;  %p2476_p9 = scmp.lt.u32.totalorder %s2472_s19, %s3874_s3 }
 0x185   :  { %p2478_p10 = pnand %p2476_p9, %p2473_p8 }
 0x187   :  { %2481 = shalt.err (!%p2478_p10)
}
 0x188   :  { %2221 = dma.vmem_to_hbm [thread:$0]  %s2216_s17, 4096, %s3874_s3, [#allocation4], %s2501_s8, %s2501_s8, %s2502_s9  }
 0x189   :  { %2492 = dma.done.wait [#allocation4], 4096  }
 0x18a   :  { %2493 = vsyncadd [#allocation4], 4294963200 }
 0x18b   :  { %2225 = vsyncpa [#allocation3], 1 }
 0x18c   :  { %2226 = vsyncpa [#allocation4], 1 }
 0x18d   :  { %2227 = vsyncpa [#allocation5], 1 }
 0x18e   :  { %2228 = vsyncpa [#allocation6], 1 }

</bundles_post_ra>
